<compile_context>
chip_gen: v7x
topology: tpu7x:2x2x1
jax: 0.10.0
libtpu: 0.0.40
codegen_flags: <defaults>
</compile_context>

<pallas_src>
import functools
import math

import jax
import jax.numpy as jnp
from jax.experimental import pallas as pl
from jax.experimental.pallas import tpu as pltpu


# --------------------------------------------------------------------------
# Kernel 1: fused qkv projection + chunked relu local attention (all heads)
# --------------------------------------------------------------------------
def _chunk_attn_kernel(x_ref, w_ref, b_ref, out_ref, prob_ref, qkv_ref, *,
                       scaling, chunk, n_heads, head_dim, d_model,
                       block_rows, valid_len, mask_needed):
    x = x_ref[0]                                                    # (RB, E)

    # One fused projection matmul: (RB, E) @ (E, 3E) -> lane-dense output.
    qkv_ref[...] = (jnp.dot(x, w_ref[...], preferred_element_type=jnp.float32)
                    + b_ref[...])

    # Torch pads q/k/v with zeros AFTER the linear projections; reproduce
    # that only on the row block that actually contains padded rows.
    if mask_needed:
        row0 = pl.program_id(1) * block_rows

        @pl.when(row0 + block_rows > valid_len)
        def _():
            rows = row0 + jax.lax.broadcasted_iota(
                jnp.int32, (block_rows, 1), 0)
            qkv_ref[...] = jnp.where(rows < valid_len, qkv_ref[...], 0.0)

    E = d_model
    n_chunks = block_rows // chunk
    for g in range(n_chunks):                       # static, small unroll
        r0 = g * chunk
        for h in range(n_heads):
            c0 = h * head_dim
            q = qkv_ref[r0:r0 + chunk, c0:c0 + head_dim] * scaling
            k = qkv_ref[r0:r0 + chunk, E + c0:E + c0 + head_dim]
            v = qkv_ref[r0:r0 + chunk, 2 * E + c0:2 * E + c0 + head_dim]
            # s = q @ k^T  (contract head_dim of both operands)
            s = jax.lax.dot_general(q, k, (((1,), (1,)), ((), ())),
                                    preferred_element_type=jnp.float32)
            p = jnp.maximum(s, 0.0)                               # act='relu'
            o = jnp.dot(p, v, preferred_element_type=jnp.float32)
            prob_ref[h, g, :, :] = p.astype(prob_ref.dtype)
            out_ref[0, r0:r0 + chunk, c0:c0 + head_dim] = o.astype(out_ref.dtype)


def _chunk_attention(x_pad, wqkv, bqkv, *, n_heads, chunk_size, block_rows,
                     valid_len):
    B, L_pad, E = x_pad.shape
    H = n_heads
    D = E // H
    C = chunk_size
    n_rb = L_pad // block_rows
    g_per_block = block_rows // C
    G_pad = L_pad // C
    scaling = float(D) ** -0.5

    kernel = functools.partial(
        _chunk_attn_kernel, scaling=scaling, chunk=C, n_heads=H, head_dim=D,
        d_model=E, block_rows=block_rows, valid_len=valid_len,
        mask_needed=(L_pad != valid_len))

    out, prob = pl.pallas_call(
        kernel,
        out_shape=(
            jax.ShapeDtypeStruct((B, L_pad, E), jnp.float32),
            jax.ShapeDtypeStruct((B * H, G_pad, C, C), jnp.float32),
        ),
        grid=(B, n_rb),
        in_specs=[
            pl.BlockSpec((1, block_rows, E), lambda b, r: (b, r, 0)),
            pl.BlockSpec((E, 3 * E), lambda b, r: (0, 0)),    # weights resident
            pl.BlockSpec((1, 3 * E), lambda b, r: (0, 0)),
        ],
        out_specs=(
            pl.BlockSpec((1, block_rows, E), lambda b, r: (b, r, 0)),
            pl.BlockSpec((H, g_per_block, C, C), lambda b, r: (b, r, 0, 0)),
        ),
        scratch_shapes=[pltpu.VMEM((block_rows, 3 * E), jnp.float32)],
        compiler_params=pltpu.CompilerParams(
            dimension_semantics=("parallel", "parallel")),
    )(x_pad, wqkv, bqkv)
    return out, prob


# --------------------------------------------------------------------------
# Kernel 2: fused gated RMS norm + output projection (row-tiled)
# --------------------------------------------------------------------------
def _norm_outproj_kernel(x_ref, scale_ref, gate_ref, wo_ref, bo_ref, o_ref,
                         *, d_model, eps):
    x = x_ref[...]                                                  # (TR, E)
    rms = jnp.sqrt(jnp.sum(x * x, axis=-1, keepdims=True)) * (float(d_model) ** -0.5)
    x_normed = x / (rms + eps)
    y = scale_ref[...] * x_normed * jax.nn.sigmoid(gate_ref[...] * x)
    o = jnp.dot(y, wo_ref[...], preferred_element_type=jnp.float32) + bo_ref[...]
    o_ref[...] = o.astype(o_ref.dtype)


def _norm_outproj(x_flat, scale, gate, wo_t, bo, *, row_tile, eps=1e-8):
    N, E = x_flat.shape
    kernel = functools.partial(_norm_outproj_kernel, d_model=E, eps=eps)
    return pl.pallas_call(
        kernel,
        out_shape=jax.ShapeDtypeStruct((N, E), jnp.float32),
        grid=(N // row_tile,),
        in_specs=[
            pl.BlockSpec((row_tile, E), lambda i: (i, 0)),
            pl.BlockSpec((1, E), lambda i: (0, 0)),
            pl.BlockSpec((1, E), lambda i: (0, 0)),
            pl.BlockSpec((E, E), lambda i: (0, 0)),               # wo resident
            pl.BlockSpec((1, E), lambda i: (0, 0)),
        ],
        out_specs=pl.BlockSpec((row_tile, E), lambda i: (i, 0)),
        compiler_params=pltpu.CompilerParams(
            dimension_semantics=("parallel",)),
    )(x_flat, scale, gate, wo_t, bo)


# --------------------------------------------------------------------------
# Full forward
# --------------------------------------------------------------------------
def norm_local_attention_forward(x, params, *, n_heads, chunk_size,
                                 block_rows_target=256):
    """x: (B, L, E)   returns (output (B, L, E), prob (B*H, G, C, C))."""
    B, L, E = x.shape
    H = n_heads
    C = chunk_size
    G_ref = -(-L // C)                                   # ceil(L / chunk)

    # Row block: several chunks per grid step (>=128 rows when L allows).
    g_per_block = max(1, min(block_rows_target // C, G_ref))
    RB = g_per_block * C
    n_rb = -(-L // RB)
    L_pad = n_rb * RB

    x_pad = x if L_pad == L else jnp.pad(x, ((0, 0), (0, L_pad - L), (0, 0)))

    # Fuse the three projections: y = x @ [Wq^T | Wk^T | Wv^T] + [bq|bk|bv].
    wqkv = jnp.concatenate(
        [params["wq"].T, params["wk"].T, params["wv"].T], axis=1)   # (E, 3E)
    bqkv = jnp.concatenate(
        [params["bq"], params["bk"], params["bv"]]).reshape(1, 3 * E)

    attn, prob = _chunk_attention(x_pad, wqkv, bqkv, n_heads=H, chunk_size=C,
                                  block_rows=RB, valid_len=L)

    y = _norm_outproj(attn.reshape(B * L_pad, E),
                      params["scale"].reshape(1, E),
                      params["gate"].reshape(1, E),
                      params["wo"].T,
                      params["bo"].reshape(1, E),
                      row_tile=RB)

    out = y.reshape(B, L_pad, E)[:, :L, :]
    if prob.shape[1] != G_ref:                  # extra row-block padding only
        prob = prob[:, :G_ref]
    return out, prob


# --------------------------------------------------------------------------
# Pure-JAX reference (mirrors the PyTorch forward) for verification
# --------------------------------------------------------------------------
def reference_forward(x, p, *, n_heads, chunk_size, eps=1e-8):
    B, L, E = x.shape
    H = n_heads
    D = E // H
    scaling = float(D) ** -0.5

    q = (x @ p["wq"].T + p["bq"]) * scaling
    k = x @ p["wk"].T + p["bk"]
    v = x @ p["wv"].T + p["bv"]

    len_pad = (-L) % chunk_size
    L_pad = L + len_pad
    G = L_pad // chunk_size
    pad = lambda t: jnp.pad(t, ((0, 0), (0, len_pad), (0, 0)))
    q, k, v = pad(q), pad(k), pad(v)

    def tr(t):  # (B, L_pad, H*D) -> ((B*H), G, C, D), b-major / h-minor
        t = t.reshape(B, G, chunk_size, H, D)
        return t.transpose(0, 3, 1, 2, 4).reshape(B * H, G, chunk_size, D)

    q, k, v = tr(q), tr(k), tr(v)
    logits = jnp.einsum("ngle,ngse->ngls", q, k)
    prob = jnp.maximum(logits, 0.0)
    o = jnp.einsum("ngls,ngsd->ngld", prob, v)
    o = (o.reshape(B, H, G, chunk_size, D)
          .transpose(0, 2, 3, 1, 4)
          .reshape(B, L_pad, E)[:, :L, :])

    norm = jnp.linalg.norm(o, axis=-1, keepdims=True)
    rms = norm * float(E) ** -0.5
    xn = o / (rms + eps)
    y = p["scale"] * xn * jax.nn.sigmoid(p["gate"] * o)
    out = y @ p["wo"].T + p["bo"]
    return out, prob


# --------------------------------------------------------------------------
def init_params(key, d_model):
    E = d_model
    ks = jax.random.split(key, 7)
    xav = math.sqrt(6.0 / (E + E))        # xavier_uniform_ for square weights
    lin_b = 1.0 / math.sqrt(E)            # default nn.Linear bias init
    return {
        "wq": jax.random.uniform(ks[0], (E, E), jnp.float32, -xav, xav),
        "wk": jax.random.uniform(ks[1], (E, E), jnp.float32, -xav, xav),
        "wv": jax.random.uniform(ks[2], (E, E), jnp.float32, -xav, xav),
        "wo": jax.random.uniform(ks[3], (E, E), jnp.float32, -xav, xav),
        "bq": jax.random.uniform(ks[4], (E,), jnp.float32, -lin_b, lin_b),
        "bk": jax.random.uniform(ks[5], (E,), jnp.float32, -lin_b, lin_b),
        "bv": jax.random.uniform(ks[6], (E,), jnp.float32, -lin_b, lin_b),
        "bo": jnp.zeros((E,), jnp.float32),          # out_proj.bias init to 0
        "scale": jnp.ones((E,), jnp.float32),        # GatedRMSNorm scale
        "gate": jnp.ones((E,), jnp.float32),         # GatedRMSNorm gate
    }


if __name__ == "__main__":
    B, L, E, H, CHUNK = 2, 48, 64, 4, 32   # L not a multiple of chunk -> exercises padding

    key = jax.random.PRNGKey(0)
    kx, kp = jax.random.split(key)
    x = jax.random.normal(kx, (B, L, E), jnp.float32)
    params = init_params(kp, E)

    out, prob = norm_local_attention_forward(x, params, n_heads=H, chunk_size=CHUNK)
    out = jax.block_until_ready(out)
    prob = jax.block_until_ready(prob)

    ref_out, ref_prob = reference_forward(x, params, n_heads=H, chunk_size=CHUNK)
    G_ref = L // CHUNK + (1 if L % CHUNK else 0)
    assert out.shape == (B, L, E)
    assert prob.shape == (B * H, G_ref, CHUNK, CHUNK)
    assert jnp.allclose(out, ref_out, atol=1e-4, rtol=1e-4)
    assert jnp.allclose(prob, ref_prob, atol=1e-4, rtol=1e-4)

    print("KERNEL_OK")
</pallas_src>

<mosaic_0001>
module attributes {stable_mosaic.version = 11 : i64} {
  func.func @_chunk_attn_kernel(%arg0: i32, %arg1: i32, %arg2: memref<1x64x64xf32, #tpu.memory_space<vmem>>, %arg3: memref<64x192xf32, #tpu.memory_space<vmem>>, %arg4: memref<1x192xf32, #tpu.memory_space<vmem>>, %arg5: memref<1x64x64xf32, #tpu.memory_space<vmem>>, %arg6: memref<4x2x32x32xf32, #tpu.memory_space<vmem>>, %arg7: memref<64x192xf32, #tpu.memory_space<vmem>>) attributes {dimension_semantics = [#tpu.dimension_semantics<parallel>, #tpu.dimension_semantics<parallel>], iteration_bounds = array<i64: 2, 1>, scalar_prefetch = 0 : i64, scratch_operands = 1 : i64, tpu.core_type = #tpu.core_type<tc>, window_params = [{transform_indices = @transform_0, window_bounds = array<i64: 1, 64, 64>}, {pipeline_mode = #tpu.pipeline_mode<synchronous>, transform_indices = @transform_1, window_bounds = array<i64: 64, 192>}, {pipeline_mode = #tpu.pipeline_mode<synchronous>, transform_indices = @transform_2, window_bounds = array<i64: 1, 192>}, {transform_indices = @transform_3, window_bounds = array<i64: 1, 64, 64>}, {transform_indices = @transform_4, window_bounds = array<i64: 4, 2, 32, 32>}]} {
    %c0 = arith.constant 0 : index
    %c0_0 = arith.constant 0 : index
    %c0_1 = arith.constant 0 : index
    %0 = vector.load %arg2[%c0, %c0_0, %c0_1] : memref<1x64x64xf32, #tpu.memory_space<vmem>>, vector<1x64x64xf32>
    %1 = vector.shape_cast %0 : vector<1x64x64xf32> to vector<64x64xf32>
    %c0_2 = arith.constant 0 : index
    %c0_3 = arith.constant 0 : index
    %2 = vector.load %arg3[%c0_2, %c0_3] : memref<64x192xf32, #tpu.memory_space<vmem>>, vector<64x192xf32>
    %cst = arith.constant dense<0.000000e+00> : vector<64x192xf32>
    %3 = tpu.matmul %1, %2, %cst {dimension_numbers = #tpu.dot_dimension_numbers<[1], [0], [0], [1], [0, 0, 1, 1], [], []>} : vector<64x64xf32>, vector<64x192xf32>, vector<64x192xf32> -> vector<64x192xf32>
    %c0_4 = arith.constant 0 : index
    %c0_5 = arith.constant 0 : index
    %4 = vector.load %arg4[%c0_4, %c0_5] : memref<1x192xf32, #tpu.memory_space<vmem>>, vector<1x192xf32>
    %5 = vector.broadcast %4 : vector<1x192xf32> to vector<64x192xf32>
    %6 = arith.addf %3, %5 : vector<64x192xf32>
    %c0_6 = arith.constant 0 : index
    %c0_7 = arith.constant 0 : index
    %7 = vector.load %arg7[%c0_6, %c0_7] : memref<64x192xf32, #tpu.memory_space<vmem>>, vector<64x192xf32>
    tpu.vector_store %arg7[%c0_6, %c0_7], %6 {strides = array<i32>} : memref<64x192xf32, #tpu.memory_space<vmem>>, vector<64x192xf32>,
    %c64_i32 = arith.constant 64 : i32
    %8 = arith.muli %arg1, %c64_i32 : i32
    %c64_i32_8 = arith.constant 64 : i32
    %9 = arith.addi %8, %c64_i32_8 : i32
    %c48_i32 = arith.constant 48 : i32
    %10 = arith.cmpi sgt, %9, %c48_i32 : i32
    %11 = arith.extui %10 : i1 to i32
    %c0_i32 = arith.constant 0 : i32
    %12 = arith.cmpi ne, %11, %c0_i32 : i32
    scf.if %12 {
      %133 = tpu.iota {dimensions = array<i32: 0>} : vector<64x1xi32>
      %134 = vector.broadcast %8 : i32 to vector<64x1xi32>
      %135 = arith.addi %134, %133 : vector<64x1xi32>
      %c48_i32_131 = arith.constant 48 : i32
      %136 = vector.broadcast %c48_i32_131 : i32 to vector<64x1xi32>
      %137 = arith.cmpi slt, %135, %136 : vector<64x1xi32>
      %c0_132 = arith.constant 0 : index
      %c0_133 = arith.constant 0 : index
      %138 = vector.load %arg7[%c0_132, %c0_133] : memref<64x192xf32, #tpu.memory_space<vmem>>, vector<64x192xf32>
      %cst_134 = arith.constant 0.000000e+00 : f32
      %139 = vector.shape_cast %137 : vector<64x1xi1> to vector<64x1xi1>
      %140 = vector.broadcast %139 : vector<64x1xi1> to vector<64x192xi1>
      %141 = vector.broadcast %cst_134 : f32 to vector<64x192xf32>
      %142 = arith.select %140, %138, %141 : vector<64x192xi1>, vector<64x192xf32>
      %c0_135 = arith.constant 0 : index
      %c0_136 = arith.constant 0 : index
      %143 = vector.load %arg7[%c0_135, %c0_136] : memref<64x192xf32, #tpu.memory_space<vmem>>, vector<64x192xf32>
      tpu.vector_store %arg7[%c0_135, %c0_136], %142 {strides = array<i32>} : memref<64x192xf32, #tpu.memory_space<vmem>>, vector<64x192xf32>,
    } else {
    }
    %c0_9 = arith.constant 0 : index
    %c0_10 = arith.constant 0 : index
    %13 = vector.load %arg7[%c0_9, %c0_10] : memref<64x192xf32, #tpu.memory_space<vmem>>, vector<32x16xf32>
    %cst_11 = arith.constant 2.500000e-01 : f32
    %14 = vector.broadcast %cst_11 : f32 to vector<32x16xf32>
    %15 = arith.mulf %13, %14 : vector<32x16xf32>
    %c0_12 = arith.constant 0 : index
    %c64 = arith.constant 64 : index
    %16 = vector.load %arg7[%c0_12, %c64] : memref<64x192xf32, #tpu.memory_space<vmem>>, vector<32x16xf32>
    %c0_13 = arith.constant 0 : index
    %c128 = arith.constant 128 : index
    %17 = vector.load %arg7[%c0_13, %c128] : memref<64x192xf32, #tpu.memory_space<vmem>>, vector<32x16xf32>
    %cst_14 = arith.constant dense<0.000000e+00> : vector<32x32xf32>
    %18 = tpu.matmul %15, %16, %cst_14 {dimension_numbers = #tpu.dot_dimension_numbers<[1], [1], [0], [0], [0, 0, 1, 0], [], []>} : vector<32x16xf32>, vector<32x16xf32>, vector<32x32xf32> -> vector<32x32xf32>
    %cst_15 = arith.constant 0.000000e+00 : f32
    %19 = vector.broadcast %cst_15 : f32 to vector<32x32xf32>
    %20 = arith.maximumf %18, %19 : vector<32x32xf32>
    %cst_16 = arith.constant dense<0.000000e+00> : vector<32x16xf32>
    %21 = tpu.matmul %20, %17, %cst_16 {dimension_numbers = #tpu.dot_dimension_numbers<[1], [0], [0], [1], [0, 0, 1, 1], [], []>} : vector<32x32xf32>, vector<32x16xf32>, vector<32x16xf32> -> vector<32x16xf32>
    %c0_17 = arith.constant 0 : index
    %c0_18 = arith.constant 0 : index
    %c0_19 = arith.constant 0 : index
    %c0_20 = arith.constant 0 : index
    %22 = vector.load %arg6[%c0_17, %c0_18, %c0_19, %c0_20] : memref<4x2x32x32xf32, #tpu.memory_space<vmem>>, vector<1x1x32x32xf32>
    %23 = vector.shape_cast %22 : vector<1x1x32x32xf32> to vector<32x32xf32>
    %24 = vector.shape_cast %20 : vector<32x32xf32> to vector<1x1x32x32xf32>
    tpu.vector_store %arg6[%c0_17, %c0_18, %c0_19, %c0_20], %24 {strides = array<i32>} : memref<4x2x32x32xf32, #tpu.memory_space<vmem>>, vector<1x1x32x32xf32>,
    %c0_21 = arith.constant 0 : index
    %c0_22 = arith.constant 0 : index
    %c0_23 = arith.constant 0 : index
    %25 = vector.load %arg5[%c0_21, %c0_22, %c0_23] : memref<1x64x64xf32, #tpu.memory_space<vmem>>, vector<1x32x16xf32>
    %26 = vector.shape_cast %25 : vector<1x32x16xf32> to vector<32x16xf32>
    %27 = vector.shape_cast %21 : vector<32x16xf32> to vector<1x32x16xf32>
    tpu.vector_store %arg5[%c0_21, %c0_22, %c0_23], %27 {strides = array<i32>} : memref<1x64x64xf32, #tpu.memory_space<vmem>>, vector<1x32x16xf32>,
    %c0_24 = arith.constant 0 : index
    %c16 = arith.constant 16 : index
    %28 = vector.load %arg7[%c0_24, %c16] : memref<64x192xf32, #tpu.memory_space<vmem>>, vector<32x16xf32>
    %cst_25 = arith.constant 2.500000e-01 : f32
    %29 = vector.broadcast %cst_25 : f32 to vector<32x16xf32>
    %30 = arith.mulf %28, %29 : vector<32x16xf32>
    %c0_26 = arith.constant 0 : index
    %c80 = arith.constant 80 : index
    %31 = vector.load %arg7[%c0_26, %c80] : memref<64x192xf32, #tpu.memory_space<vmem>>, vector<32x16xf32>
    %c0_27 = arith.constant 0 : index
    %c144 = arith.constant 144 : index
    %32 = vector.load %arg7[%c0_27, %c144] : memref<64x192xf32, #tpu.memory_space<vmem>>, vector<32x16xf32>
    %cst_28 = arith.constant dense<0.000000e+00> : vector<32x32xf32>
    %33 = tpu.matmul %30, %31, %cst_28 {dimension_numbers = #tpu.dot_dimension_numbers<[1], [1], [0], [0], [0, 0, 1, 0], [], []>} : vector<32x16xf32>, vector<32x16xf32>, vector<32x32xf32> -> vector<32x32xf32>
    %cst_29 = arith.constant 0.000000e+00 : f32
    %34 = vector.broadcast %cst_29 : f32 to vector<32x32xf32>
    %35 = arith.maximumf %33, %34 : vector<32x32xf32>
    %cst_30 = arith.constant dense<0.000000e+00> : vector<32x16xf32>
    %36 = tpu.matmul %35, %32, %cst_30 {dimension_numbers = #tpu.dot_dimension_numbers<[1], [0], [0], [1], [0, 0, 1, 1], [], []>} : vector<32x32xf32>, vector<32x16xf32>, vector<32x16xf32> -> vector<32x16xf32>
    %c1 = arith.constant 1 : index
    %c0_31 = arith.constant 0 : index
    %c0_32 = arith.constant 0 : index
    %c0_33 = arith.constant 0 : index
    %37 = vector.load %arg6[%c1, %c0_31, %c0_32, %c0_33] : memref<4x2x32x32xf32, #tpu.memory_space<vmem>>, vector<1x1x32x32xf32>
    %38 = vector.shape_cast %37 : vector<1x1x32x32xf32> to vector<32x32xf32>
    %39 = vector.shape_cast %35 : vector<32x32xf32> to vector<1x1x32x32xf32>
    tpu.vector_store %arg6[%c1, %c0_31, %c0_32, %c0_33], %39 {strides = array<i32>} : memref<4x2x32x32xf32, #tpu.memory_space<vmem>>, vector<1x1x32x32xf32>,
    %c0_34 = arith.constant 0 : index
    %c0_35 = arith.constant 0 : index
    %c16_36 = arith.constant 16 : index
    %40 = vector.load %arg5[%c0_34, %c0_35, %c16_36] : memref<1x64x64xf32, #tpu.memory_space<vmem>>, vector<1x32x16xf32>
    %41 = vector.shape_cast %40 : vector<1x32x16xf32> to vector<32x16xf32>
    %42 = vector.shape_cast %36 : vector<32x16xf32> to vector<1x32x16xf32>
    tpu.vector_store %arg5[%c0_34, %c0_35, %c16_36], %42 {strides = array<i32>} : memref<1x64x64xf32, #tpu.memory_space<vmem>>, vector<1x32x16xf32>,
    %c0_37 = arith.constant 0 : index
    %c32 = arith.constant 32 : index
    %43 = vector.load %arg7[%c0_37, %c32] : memref<64x192xf32, #tpu.memory_space<vmem>>, vector<32x16xf32>
    %cst_38 = arith.constant 2.500000e-01 : f32
    %44 = vector.broadcast %cst_38 : f32 to vector<32x16xf32>
    %45 = arith.mulf %43, %44 : vector<32x16xf32>
    %c0_39 = arith.constant 0 : index
    %c96 = arith.constant 96 : index
    %46 = vector.load %arg7[%c0_39, %c96] : memref<64x192xf32, #tpu.memory_space<vmem>>, vector<32x16xf32>
    %c0_40 = arith.constant 0 : index
    %c160 = arith.constant 160 : index
    %47 = vector.load %arg7[%c0_40, %c160] : memref<64x192xf32, #tpu.memory_space<vmem>>, vector<32x16xf32>
    %cst_41 = arith.constant dense<0.000000e+00> : vector<32x32xf32>
    %48 = tpu.matmul %45, %46, %cst_41 {dimension_numbers = #tpu.dot_dimension_numbers<[1], [1], [0], [0], [0, 0, 1, 0], [], []>} : vector<32x16xf32>, vector<32x16xf32>, vector<32x32xf32> -> vector<32x32xf32>
    %cst_42 = arith.constant 0.000000e+00 : f32
    %49 = vector.broadcast %cst_42 : f32 to vector<32x32xf32>
    %50 = arith.maximumf %48, %49 : vector<32x32xf32>
    %cst_43 = arith.constant dense<0.000000e+00> : vector<32x16xf32>
    %51 = tpu.matmul %50, %47, %cst_43 {dimension_numbers = #tpu.dot_dimension_numbers<[1], [0], [0], [1], [0, 0, 1, 1], [], []>} : vector<32x32xf32>, vector<32x16xf32>, vector<32x16xf32> -> vector<32x16xf32>
    %c2 = arith.constant 2 : index
    %c0_44 = arith.constant 0 : index
    %c0_45 = arith.constant 0 : index
    %c0_46 = arith.constant 0 : index
    %52 = vector.load %arg6[%c2, %c0_44, %c0_45, %c0_46] : memref<4x2x32x32xf32, #tpu.memory_space<vmem>>, vector<1x1x32x32xf32>
    %53 = vector.shape_cast %52 : vector<1x1x32x32xf32> to vector<32x32xf32>
    %54 = vector.shape_cast %50 : vector<32x32xf32> to vector<1x1x32x32xf32>
    tpu.vector_store %arg6[%c2, %c0_44, %c0_45, %c0_46], %54 {strides = array<i32>} : memref<4x2x32x32xf32, #tpu.memory_space<vmem>>, vector<1x1x32x32xf32>,
    %c0_47 = arith.constant 0 : index
    %c0_48 = arith.constant 0 : index
    %c32_49 = arith.constant 32 : index
    %55 = vector.load %arg5[%c0_47, %c0_48, %c32_49] : memref<1x64x64xf32, #tpu.memory_space<vmem>>, vector<1x32x16xf32>
    %56 = vector.shape_cast %55 : vector<1x32x16xf32> to vector<32x16xf32>
    %57 = vector.shape_cast %51 : vector<32x16xf32> to vector<1x32x16xf32>
    tpu.vector_store %arg5[%c0_47, %c0_48, %c32_49], %57 {strides = array<i32>} : memref<1x64x64xf32, #tpu.memory_space<vmem>>, vector<1x32x16xf32>,
    %c0_50 = arith.constant 0 : index
    %c48 = arith.constant 48 : index
    %58 = vector.load %arg7[%c0_50, %c48] : memref<64x192xf32, #tpu.memory_space<vmem>>, vector<32x16xf32>
    %cst_51 = arith.constant 2.500000e-01 : f32
    %59 = vector.broadcast %cst_51 : f32 to vector<32x16xf32>
    %60 = arith.mulf %58, %59 : vector<32x16xf32>
    %c0_52 = arith.constant 0 : index
    %c112 = arith.constant 112 : index
    %61 = vector.load %arg7[%c0_52, %c112] : memref<64x192xf32, #tpu.memory_space<vmem>>, vector<32x16xf32>
    %c0_53 = arith.constant 0 : index
    %c176 = arith.constant 176 : index
    %62 = vector.load %arg7[%c0_53, %c176] : memref<64x192xf32, #tpu.memory_space<vmem>>, vector<32x16xf32>
    %cst_54 = arith.constant dense<0.000000e+00> : vector<32x32xf32>
    %63 = tpu.matmul %60, %61, %cst_54 {dimension_numbers = #tpu.dot_dimension_numbers<[1], [1], [0], [0], [0, 0, 1, 0], [], []>} : vector<32x16xf32>, vector<32x16xf32>, vector<32x32xf32> -> vector<32x32xf32>
    %cst_55 = arith.constant 0.000000e+00 : f32
    %64 = vector.broadcast %cst_55 : f32 to vector<32x32xf32>
    %65 = arith.maximumf %63, %64 : vector<32x32xf32>
    %cst_56 = arith.constant dense<0.000000e+00> : vector<32x16xf32>
    %66 = tpu.matmul %65, %62, %cst_56 {dimension_numbers = #tpu.dot_dimension_numbers<[1], [0], [0], [1], [0, 0, 1, 1], [], []>} : vector<32x32xf32>, vector<32x16xf32>, vector<32x16xf32> -> vector<32x16xf32>
    %c3 = arith.constant 3 : index
    %c0_57 = arith.constant 0 : index
    %c0_58 = arith.constant 0 : index
    %c0_59 = arith.constant 0 : index
    %67 = vector.load %arg6[%c3, %c0_57, %c0_58, %c0_59] : memref<4x2x32x32xf32, #tpu.memory_space<vmem>>, vector<1x1x32x32xf32>
    %68 = vector.shape_cast %67 : vector<1x1x32x32xf32> to vector<32x32xf32>
    %69 = vector.shape_cast %65 : vector<32x32xf32> to vector<1x1x32x32xf32>
    tpu.vector_store %arg6[%c3, %c0_57, %c0_58, %c0_59], %69 {strides = array<i32>} : memref<4x2x32x32xf32, #tpu.memory_space<vmem>>, vector<1x1x32x32xf32>,
    %c0_60 = arith.constant 0 : index
    %c0_61 = arith.constant 0 : index
    %c48_62 = arith.constant 48 : index
    %70 = vector.load %arg5[%c0_60, %c0_61, %c48_62] : memref<1x64x64xf32, #tpu.memory_space<vmem>>, vector<1x32x16xf32>
    %71 = vector.shape_cast %70 : vector<1x32x16xf32> to vector<32x16xf32>
    %72 = vector.shape_cast %66 : vector<32x16xf32> to vector<1x32x16xf32>
    tpu.vector_store %arg5[%c0_60, %c0_61, %c48_62], %72 {strides = array<i32>} : memref<1x64x64xf32, #tpu.memory_space<vmem>>, vector<1x32x16xf32>,
    %c32_63 = arith.constant 32 : index
    %c0_64 = arith.constant 0 : index
    %73 = vector.load %arg7[%c32_63, %c0_64] : memref<64x192xf32, #tpu.memory_space<vmem>>, vector<32x16xf32>
    %cst_65 = arith.constant 2.500000e-01 : f32
    %74 = vector.broadcast %cst_65 : f32 to vector<32x16xf32>
    %75 = arith.mulf %73, %74 : vector<32x16xf32>
    %c32_66 = arith.constant 32 : index
    %c64_67 = arith.constant 64 : index
    %76 = vector.load %arg7[%c32_66, %c64_67] : memref<64x192xf32, #tpu.memory_space<vmem>>, vector<32x16xf32>
    %c32_68 = arith.constant 32 : index
    %c128_69 = arith.constant 128 : index
    %77 = vector.load %arg7[%c32_68, %c128_69] : memref<64x192xf32, #tpu.memory_space<vmem>>, vector<32x16xf32>
    %cst_70 = arith.constant dense<0.000000e+00> : vector<32x32xf32>
    %78 = tpu.matmul %75, %76, %cst_70 {dimension_numbers = #tpu.dot_dimension_numbers<[1], [1], [0], [0], [0, 0, 1, 0], [], []>} : vector<32x16xf32>, vector<32x16xf32>, vector<32x32xf32> -> vector<32x32xf32>
    %cst_71 = arith.constant 0.000000e+00 : f32
    %79 = vector.broadcast %cst_71 : f32 to vector<32x32xf32>
    %80 = arith.maximumf %78, %79 : vector<32x32xf32>
    %cst_72 = arith.constant dense<0.000000e+00> : vector<32x16xf32>
    %81 = tpu.matmul %80, %77, %cst_72 {dimension_numbers = #tpu.dot_dimension_numbers<[1], [0], [0], [1], [0, 0, 1, 1], [], []>} : vector<32x32xf32>, vector<32x16xf32>, vector<32x16xf32> -> vector<32x16xf32>
    %c0_73 = arith.constant 0 : index
    %c1_74 = arith.constant 1 : index
    %c0_75 = arith.constant 0 : index
    %c0_76 = arith.constant 0 : index
    %82 = vector.load %arg6[%c0_73, %c1_74, %c0_75, %c0_76] : memref<4x2x32x32xf32, #tpu.memory_space<vmem>>, vector<1x1x32x32xf32>
    %83 = vector.shape_cast %82 : vector<1x1x32x32xf32> to vector<32x32xf32>
    %84 = vector.shape_cast %80 : vector<32x32xf32> to vector<1x1x32x32xf32>
    tpu.vector_store %arg6[%c0_73, %c1_74, %c0_75, %c0_76], %84 {strides = array<i32>} : memref<4x2x32x32xf32, #tpu.memory_space<vmem>>, vector<1x1x32x32xf32>,
    %c0_77 = arith.constant 0 : index
    %c32_78 = arith.constant 32 : index
    %c0_79 = arith.constant 0 : index
    %85 = vector.load %arg5[%c0_77, %c32_78, %c0_79] : memref<1x64x64xf32, #tpu.memory_space<vmem>>, vector<1x32x16xf32>
    %86 = vector.shape_cast %85 : vector<1x32x16xf32> to vector<32x16xf32>
    %87 = vector.shape_cast %81 : vector<32x16xf32> to vector<1x32x16xf32>
    tpu.vector_store %arg5[%c0_77, %c32_78, %c0_79], %87 {strides = array<i32>} : memref<1x64x64xf32, #tpu.memory_space<vmem>>, vector<1x32x16xf32>,
    %c32_80 = arith.constant 32 : index
    %c16_81 = arith.constant 16 : index
    %88 = vector.load %arg7[%c32_80, %c16_81] : memref<64x192xf32, #tpu.memory_space<vmem>>, vector<32x16xf32>
    %cst_82 = arith.constant 2.500000e-01 : f32
    %89 = vector.broadcast %cst_82 : f32 to vector<32x16xf32>
    %90 = arith.mulf %88, %89 : vector<32x16xf32>
    %c32_83 = arith.constant 32 : index
    %c80_84 = arith.constant 80 : index
    %91 = vector.load %arg7[%c32_83, %c80_84] : memref<64x192xf32, #tpu.memory_space<vmem>>, vector<32x16xf32>
    %c32_85 = arith.constant 32 : index
    %c144_86 = arith.constant 144 : index
    %92 = vector.load %arg7[%c32_85, %c144_86] : memref<64x192xf32, #tpu.memory_space<vmem>>, vector<32x16xf32>
    %cst_87 = arith.constant dense<0.000000e+00> : vector<32x32xf32>
    %93 = tpu.matmul %90, %91, %cst_87 {dimension_numbers = #tpu.dot_dimension_numbers<[1], [1], [0], [0], [0, 0, 1, 0], [], []>} : vector<32x16xf32>, vector<32x16xf32>, vector<32x32xf32> -> vector<32x32xf32>
    %cst_88 = arith.constant 0.000000e+00 : f32
    %94 = vector.broadcast %cst_88 : f32 to vector<32x32xf32>
    %95 = arith.maximumf %93, %94 : vector<32x32xf32>
    %cst_89 = arith.constant dense<0.000000e+00> : vector<32x16xf32>
    %96 = tpu.matmul %95, %92, %cst_89 {dimension_numbers = #tpu.dot_dimension_numbers<[1], [0], [0], [1], [0, 0, 1, 1], [], []>} : vector<32x32xf32>, vector<32x16xf32>, vector<32x16xf32> -> vector<32x16xf32>
    %c1_90 = arith.constant 1 : index
    %c1_91 = arith.constant 1 : index
    %c0_92 = arith.constant 0 : index
    %c0_93 = arith.constant 0 : index
    %97 = vector.load %arg6[%c1_90, %c1_91, %c0_92, %c0_93] : memref<4x2x32x32xf32, #tpu.memory_space<vmem>>, vector<1x1x32x32xf32>
    %98 = vector.shape_cast %97 : vector<1x1x32x32xf32> to vector<32x32xf32>
    %99 = vector.shape_cast %95 : vector<32x32xf32> to vector<1x1x32x32xf32>
    tpu.vector_store %arg6[%c1_90, %c1_91, %c0_92, %c0_93], %99 {strides = array<i32>} : memref<4x2x32x32xf32, #tpu.memory_space<vmem>>, vector<1x1x32x32xf32>,
    %c0_94 = arith.constant 0 : index
    %c32_95 = arith.constant 32 : index
    %c16_96 = arith.constant 16 : index
    %100 = vector.load %arg5[%c0_94, %c32_95, %c16_96] : memref<1x64x64xf32, #tpu.memory_space<vmem>>, vector<1x32x16xf32>
    %101 = vector.shape_cast %100 : vector<1x32x16xf32> to vector<32x16xf32>
    %102 = vector.shape_cast %96 : vector<32x16xf32> to vector<1x32x16xf32>
    tpu.vector_store %arg5[%c0_94, %c32_95, %c16_96], %102 {strides = array<i32>} : memref<1x64x64xf32, #tpu.memory_space<vmem>>, vector<1x32x16xf32>,
    %c32_97 = arith.constant 32 : index
    %c32_98 = arith.constant 32 : index
    %103 = vector.load %arg7[%c32_97, %c32_98] : memref<64x192xf32, #tpu.memory_space<vmem>>, vector<32x16xf32>
    %cst_99 = arith.constant 2.500000e-01 : f32
    %104 = vector.broadcast %cst_99 : f32 to vector<32x16xf32>
    %105 = arith.mulf %103, %104 : vector<32x16xf32>
    %c32_100 = arith.constant 32 : index
    %c96_101 = arith.constant 96 : index
    %106 = vector.load %arg7[%c32_100, %c96_101] : memref<64x192xf32, #tpu.memory_space<vmem>>, vector<32x16xf32>
    %c32_102 = arith.constant 32 : index
    %c160_103 = arith.constant 160 : index
    %107 = vector.load %arg7[%c32_102, %c160_103] : memref<64x192xf32, #tpu.memory_space<vmem>>, vector<32x16xf32>
    %cst_104 = arith.constant dense<0.000000e+00> : vector<32x32xf32>
    %108 = tpu.matmul %105, %106, %cst_104 {dimension_numbers = #tpu.dot_dimension_numbers<[1], [1], [0], [0], [0, 0, 1, 0], [], []>} : vector<32x16xf32>, vector<32x16xf32>, vector<32x32xf32> -> vector<32x32xf32>
    %cst_105 = arith.constant 0.000000e+00 : f32
    %109 = vector.broadcast %cst_105 : f32 to vector<32x32xf32>
    %110 = arith.maximumf %108, %109 : vector<32x32xf32>
    %cst_106 = arith.constant dense<0.000000e+00> : vector<32x16xf32>
    %111 = tpu.matmul %110, %107, %cst_106 {dimension_numbers = #tpu.dot_dimension_numbers<[1], [0], [0], [1], [0, 0, 1, 1], [], []>} : vector<32x32xf32>, vector<32x16xf32>, vector<32x16xf32> -> vector<32x16xf32>
    %c2_107 = arith.constant 2 : index
    %c1_108 = arith.constant 1 : index
    %c0_109 = arith.constant 0 : index
    %c0_110 = arith.constant 0 : index
    %112 = vector.load %arg6[%c2_107, %c1_108, %c0_109, %c0_110] : memref<4x2x32x32xf32, #tpu.memory_space<vmem>>, vector<1x1x32x32xf32>
    %113 = vector.shape_cast %112 : vector<1x1x32x32xf32> to vector<32x32xf32>
    %114 = vector.shape_cast %110 : vector<32x32xf32> to vector<1x1x32x32xf32>
    tpu.vector_store %arg6[%c2_107, %c1_108, %c0_109, %c0_110], %114 {strides = array<i32>} : memref<4x2x32x32xf32, #tpu.memory_space<vmem>>, vector<1x1x32x32xf32>,
    %c0_111 = arith.constant 0 : index
    %c32_112 = arith.constant 32 : index
    %c32_113 = arith.constant 32 : index
    %115 = vector.load %arg5[%c0_111, %c32_112, %c32_113] : memref<1x64x64xf32, #tpu.memory_space<vmem>>, vector<1x32x16xf32>
    %116 = vector.shape_cast %115 : vector<1x32x16xf32> to vector<32x16xf32>
    %117 = vector.shape_cast %111 : vector<32x16xf32> to vector<1x32x16xf32>
    tpu.vector_store %arg5[%c0_111, %c32_112, %c32_113], %117 {strides = array<i32>} : memref<1x64x64xf32, #tpu.memory_space<vmem>>, vector<1x32x16xf32>,
    %c32_114 = arith.constant 32 : index
    %c48_115 = arith.constant 48 : index
    %118 = vector.load %arg7[%c32_114, %c48_115] : memref<64x192xf32, #tpu.memory_space<vmem>>, vector<32x16xf32>
    %cst_116 = arith.constant 2.500000e-01 : f32
    %119 = vector.broadcast %cst_116 : f32 to vector<32x16xf32>
    %120 = arith.mulf %118, %119 : vector<32x16xf32>
    %c32_117 = arith.constant 32 : index
    %c112_118 = arith.constant 112 : index
    %121 = vector.load %arg7[%c32_117, %c112_118] : memref<64x192xf32, #tpu.memory_space<vmem>>, vector<32x16xf32>
    %c32_119 = arith.constant 32 : index
    %c176_120 = arith.constant 176 : index
    %122 = vector.load %arg7[%c32_119, %c176_120] : memref<64x192xf32, #tpu.memory_space<vmem>>, vector<32x16xf32>
    %cst_121 = arith.constant dense<0.000000e+00> : vector<32x32xf32>
    %123 = tpu.matmul %120, %121, %cst_121 {dimension_numbers = #tpu.dot_dimension_numbers<[1], [1], [0], [0], [0, 0, 1, 0], [], []>} : vector<32x16xf32>, vector<32x16xf32>, vector<32x32xf32> -> vector<32x32xf32>
    %cst_122 = arith.constant 0.000000e+00 : f32
    %124 = vector.broadcast %cst_122 : f32 to vector<32x32xf32>
    %125 = arith.maximumf %123, %124 : vector<32x32xf32>
    %cst_123 = arith.constant dense<0.000000e+00> : vector<32x16xf32>
    %126 = tpu.matmul %125, %122, %cst_123 {dimension_numbers = #tpu.dot_dimension_numbers<[1], [0], [0], [1], [0, 0, 1, 1], [], []>} : vector<32x32xf32>, vector<32x16xf32>, vector<32x16xf32> -> vector<32x16xf32>
    %c3_124 = arith.constant 3 : index
    %c1_125 = arith.constant 1 : index
    %c0_126 = arith.constant 0 : index
    %c0_127 = arith.constant 0 : index
    %127 = vector.load %arg6[%c3_124, %c1_125, %c0_126, %c0_127] : memref<4x2x32x32xf32, #tpu.memory_space<vmem>>, vector<1x1x32x32xf32>
    %128 = vector.shape_cast %127 : vector<1x1x32x32xf32> to vector<32x32xf32>
    %129 = vector.shape_cast %125 : vector<32x32xf32> to vector<1x1x32x32xf32>
    tpu.vector_store %arg6[%c3_124, %c1_125, %c0_126, %c0_127], %129 {strides = array<i32>} : memref<4x2x32x32xf32, #tpu.memory_space<vmem>>, vector<1x1x32x32xf32>,
    %c0_128 = arith.constant 0 : index
    %c32_129 = arith.constant 32 : index
    %c48_130 = arith.constant 48 : index
    %130 = vector.load %arg5[%c0_128, %c32_129, %c48_130] : memref<1x64x64xf32, #tpu.memory_space<vmem>>, vector<1x32x16xf32>
    %131 = vector.shape_cast %130 : vector<1x32x16xf32> to vector<32x16xf32>
    %132 = vector.shape_cast %126 : vector<32x16xf32> to vector<1x32x16xf32>
    tpu.vector_store %arg5[%c0_128, %c32_129, %c48_130], %132 {strides = array<i32>} : memref<1x64x64xf32, #tpu.memory_space<vmem>>, vector<1x32x16xf32>,
    return
  }
  func.func @transform_0(%arg0: i32, %arg1: i32) -> (i32, i32, i32) {
    %c0_i32 = arith.constant 0 : i32
    %c0_i32_0 = arith.constant 0 : i32
    return %arg0, %arg1, %c0_i32 : i32, i32, i32
  }
  func.func @transform_1(%arg0: i32, %arg1: i32) -> (i32, i32) {
    %c0_i32 = arith.constant 0 : i32
    %c0_i32_0 = arith.constant 0 : i32
    %c0_i32_1 = arith.constant 0 : i32
    return %c0_i32, %c0_i32_0 : i32, i32
  }
  func.func @transform_2(%arg0: i32, %arg1: i32) -> (i32, i32) {
    %c0_i32 = arith.constant 0 : i32
    %c0_i32_0 = arith.constant 0 : i32
    %c0_i32_1 = arith.constant 0 : i32
    return %c0_i32, %c0_i32_0 : i32, i32
  }
  func.func @transform_3(%arg0: i32, %arg1: i32) -> (i32, i32, i32) {
    %c0_i32 = arith.constant 0 : i32
    %c0_i32_0 = arith.constant 0 : i32
    return %arg0, %arg1, %c0_i32 : i32, i32, i32
  }
  func.func @transform_4(%arg0: i32, %arg1: i32) -> (i32, i32, i32, i32) {
    %c0_i32 = arith.constant 0 : i32
    %c0_i32_0 = arith.constant 0 : i32
    %c0_i32_1 = arith.constant 0 : i32
    return %arg0, %arg1, %c0_i32, %c0_i32_0 : i32, i32, i32, i32
  }
}

</mosaic_0001>

<bundles_post_ra>
// kernel: tpu_custom_call.1
= control target key start
LH: loop header
LB: loop body
LE: loop exit
PB: predicated region body
PF: predicated region fallthrough
CT: control target
= control target key end

     0   :  { %10 = vsyncpa [#allocation4], 0  ;;  %s4873_s0 = inlined_call_operand.hbm [shape: f32[2,64,64], index: 0, kind: input, shape index: {}]   ;;  %s4874_s1 = inlined_call_operand.hbm [shape: f32[64,192], index: 1, kind: input, shape index: {}]   ;;  %s4875_s2 = inlined_call_operand.vmem [shape: f32[1,192], index: 2, kind: input, shape index: {}]   ;;  %s4876_s3 = inlined_call_operand.hbm [shape: f32[2,64,64], index: 3, kind: output, shape index: {0}]   ;;  %s4877_s4 = inlined_call_operand.hbm [shape: f32[8,2,32,32], index: 4, kind: output, shape index: {1}]  }
   0x1   :  { %12 = vsyncpa [#allocation4 + $0x1], 0 }
   0x2   :  { %13 = vsyncpa [#allocation7], 0 }
   0x3   :  { %14 = vsyncpa [#allocation5], 0 }
   0x4   :  { %16 = vsyncpa [#allocation5 + $0x1], 0 }
   0x5   :  { %17 = vsyncpa [#allocation10], 0 }
   0x6   :  { %19 = vsyncpa [#allocation10 + $0x1], 0  ;;  %s4020_s15 = smov 0   ;;  %s4022_s16 = smov 0  }
   0x7   :  { %s4024_s17 = smov 0   ;;  %s4026_s18 = smov 0  }
   0x8   :  { %s4028_s19 = smov 0   ;;  %s4030_s20 = smov 0  }
   0x9 LB: > { %s2881_s21 = sadd.s32 4294967295, %s3975_s20   ;;  %s2882_s22 = sadd.s32 4294967294, %s3975_s20   ;;  %s3975_s20 = sphi %s4030_s20, %s25_s20   ;;  %s3971_s19 = sphi %s4028_s19, %s4903_s19   ;;  %s3967_s18 = sphi %s4026_s18, %s4902_s18   ;;  %s3963_s17 = sphi %s4024_s17, %s4901_s17   ;;  %s3959_s16 = sphi %s4022_s16, %s4900_s16   ;;  %s3955_s15 = sphi %s4020_s15, %s4899_s15  }
   0xa   : > { %p59_p0 = scmp.ne.s32.totalorder %s3959_s16, %s3955_s15  ;;  %p4054_p1 = scmp.eq.s32.totalorder %s2881_s21, 0 }
   0xb   : > { %p4058_p2 = scmp.eq.s32.totalorder %s2881_s21, 1  ;;  %p133_p3 = scmp.eq.s32.totalorder %s2882_s22, 1 }
   0xc   : > { %s4882_s23 = scalar_select %p4054_p1, 1, 0 }
   0xd   : > { %s4883_s24 = scalar_select %p4058_p2, 1, 0 }
   0xe   : > { %p4064_p4 = por %p4054_p1, %p59_p0  ;;  %p2883_p5 = scmp.ge.s32.totalorder %s3975_s20, 1 }
   0xf   : > { %p4069_p6 = por %p133_p3, %p59_p0  ;;  %p168_p7 = scmp.lt.s32.totalorder %s3975_s20, 3 }
  0x10   : > { %s4884_s25 = scalar_select %p4064_p4, 1, 0 }
  0x11   : > { %s4885_s26 = scalar_select %p4069_p6, 1, 0 }
  0x12   : > { %p4074_p8 = pnand %p2883_p5, %p168_p7  ;;  %s3977_s28 = smov [#allocation6]  }
  0x13   : > { %s180_s29 = sshll.u32 %s3977_s28, 4  ;;  %s37_s5 = sadd.s32 1, %s3971_s19  ;;  %s181_s29 = int_to_ptr.vmem [resolvable:$true] %s180_s29 }
  0x14   : > { %s4886_s27 = scalar_select %p4074_p8, 1, 0 }
  0x15   : > { %p3577_p9 = pneg %p4074_p8  ;;  %s3799_s8 = scalar_lea.hbm %s4874_s1, 2048 }
  0x16   : > { %p3800_p12 = scmp.ne.s32.totalorder %s4874_s1, %s3799_s8  ;;  %p3806_p5 = scmp.lt.u32.totalorder %s3799_s8, %s4874_s1 }
  0x17   : > { %p4083_p11 = pnand %p3577_p9, %p4054_p1 }
  0x19   : > { %p3801_p13 = pneg %p4083_p11 }
  0x1b   : > { %p3802_p0 = pnand %p3801_p13, %p3800_p12 }
  0x1d   : > { %p3803_p3 = pneg %p3802_p0 }
  0x1f   : > { %p3808_p7 = pnand %p3806_p5, %p3803_p3 }
  0x21   : > { %3811 = shalt.err (!%p3808_p7)
}
  0x22   : > { %s3812_s13 = scalar_lea.vmem %s181_s29, 2048  ;;  %p3820_p1 = scmp.lt.s32.totalorder %s181_s29, %s181_s29 }
  0x23   : > { %p3813_p9 = scmp.ne.s32.totalorder %s181_s29, %s3812_s13  ;;  %p3821_p4 = scmp.lt.s32.totalorder %s3812_s13, %s3812_s13 }
  0x25   : > { %p3815_p10 = pnand %p3813_p9, %p3801_p13  ;;  %p3822_p8 = por %p3821_p4, %p3820_p1 }
  0x27   : > { %p3816_p6 = pneg %p3815_p10 }
  0x29   : > { %p3823_p2 = pnand %p3822_p8, %p3816_p6 }
  0x2b   : > { %3826 = shalt.err (!%p3823_p2)
}
  0x2c   : > { %s3978_s14 = smov 256   ;;  %s3979_s21 = smov 16  }
  0x2d   : > { %3580 = dma.hbm_to_vmem [thread:$0]  (!%p4083_p11), %s4874_s1, 2048, %s181_s29, [#allocation7], %s3978_s14, %s3978_s14, %s3979_s21  }
  0x2e   : > { %p39_p1 = scmp.ge.s32.totalorder %s37_s5, 2  ;;  %s46_s6 = sadd.s32 1, %s3963_s17 }
  0x2f   : > { %p53_p2 = scmp.ne.s32.totalorder %s3963_s17, %s3959_s16  ;;  %p54_p4 = scmp.eq.s32.totalorder %s3975_s20, 0 }
  0x30   : > { %s4905_s5 = smov (%p39_p1, %s37_s5), 0  ;;  %p4889_p8 = scmp.ne.s32.totalorder %s4883_s24, 0 }
  0x31   : > { %p4110_p6 = por %p54_p4, %p53_p2  ;;  %s41_s30 = ssub.s32 %s3971_s19, %s4905_s5 }
  0x32   : > { %p4116_p10 = por %p4889_p8, %p53_p2  ;;  %p3593_p12 = scmp.lt.s32.totalorder %s3975_s20, 2 }
  0x33   : > { %p44_p11 = scmp.eq.s32.totalorder %s41_s30, 0  ;;  %s197_s29 = sand.u32 1, %s3963_s17  }
  0x34   : > { %s2886_s9 = sshll.u32 %s197_s29, 6  ;;  %s3035_s11 = sshll.u32 %s3971_s19, 10 }
  0x35   : > { %s4125_s10 = scalar_select %p44_p11, %s3963_s17, %s46_s6  }
  0x36   : > { %s4131_s14 = scalar_lea.hbm %s4873_s0, %s3035_s11  ;;  %s201_s24 = scalar_lea.vmem [#allocation3], %s2886_s9 }
  0x37   : > { %s210_s21 = sshll.u32 %s201_s24, 4  ;;  %p4137_p13 = pnand %p3593_p12, %p4110_p6  ;;  %s4133_s21 = int_to_ptr.vmem [resolvable:$true] %s210_s21 }
  0x38   : > { %s4141_s28 = scalar_lea.sflag [#allocation4], %s197_s29  ;;  %s3827_s6 = scalar_lea.hbm %s4131_s14, 1024 }
  0x39   : > { %p3828_p0 = scmp.ne.s32.totalorder %s4131_s14, %s3827_s6  ;;  %p3829_p3 = pneg %p4137_p13 }
  0x3a   : > { %s3832_s7 = scalar_lea.hbm %s4873_s0, 2048  ;;  %p3833_p9 = scmp.lt.u32.totalorder %s4131_s14, %s4873_s0 }
  0x3b   : > { %p3830_p5 = pnand %p3829_p3, %p3828_p0  ;;  %p3834_p1 = scmp.lt.u32.totalorder %s3832_s7, %s3827_s6 }
  0x3c   : > { %p3836_p4 = scmp.lt.u32.totalorder %s3827_s6, %s4131_s14 }
  0x3d   : > { %p3831_p7 = pneg %p3830_p5  ;;  %p3835_p2 = por %p3834_p1, %p3833_p9 }
  0x3f   : > { %p3837_p6 = por %p3836_p4, %p3835_p2 }
  0x41   : > { %p3838_p8 = pnand %p3837_p6, %p3831_p7 }
  0x43   : > { %3841 = shalt.err (!%p3838_p8)
}
  0x44   : > { %s3842_s29 = scalar_lea.vmem %s4133_s21, 1024  ;;  %s3980_s13 = smov [#allocation3]  }
  0x45   : > { %p3843_p12 = scmp.ne.s32.totalorder %s4133_s21, %s3842_s29  ;;  %s3847_s24 = sshll.u32 %s3980_s13, 4  ;;  %s3848_s24 = int_to_ptr.vmem [resolvable:$false] %s3847_s24 }
  0x46   : > { %s3849_s30 = scalar_lea.vmem %s3848_s24, 2048  ;;  %p3850_p5 = scmp.lt.s32.totalorder %s4133_s21, %s3848_s24 }
  0x47   : > { %p3845_p11 = pnand %p3843_p12, %p3829_p3  ;;  %p3851_p9 = scmp.lt.s32.totalorder %s3849_s30, %s3842_s29 }
  0x49   : > { %p3846_p0 = pneg %p3845_p11  ;;  %p3852_p1 = por %p3851_p9, %p3850_p5 }
  0x4b   : > { %p3853_p2 = pnand %p3852_p1, %p3846_p0 }
  0x4d   : > { %3856 = shalt.err (!%p3853_p2)
}
  0x4e   : > { %s3981_s6 = smov 128   ;;  %s3982_s9 = smov 8  }
  0x4f   : > { %3584 = dma.hbm_to_vmem [thread:$0]  (!%p4137_p13), %s4131_s14, 1024, %s4133_s21, %s4141_s28, %s3981_s6, %s3981_s6, %s3982_s9  }
  0x50   : > { %p4892_p3 = scmp.ne.s32.totalorder %s4886_s27, 0 }
  0x51   : > { %s4172_s7 = sand.u32 (!%p4892_p3), 1, %s3959_s16   ;;  %p4893_p7 = scmp.ne.s32.totalorder (!%p4892_p3), %s4884_s25, 0 }
  0x52   : > { %222 = sbr.rel (%p4892_p3) target bundleno = 2437 (0x985), region = 32  ;;  %s2890_s11 = sshll.u32 (!%p4892_p3), %s4172_s7, 6 }
  0x53   : > { %s225_s12 = scalar_lea.sflag (!%p4892_p3), [#allocation4], %s4172_s7  ;;  %s4178_s29 = scalar_lea.vmem (!%p4892_p3), [#allocation3], %s2890_s11 }
  0x59   : > { %3938 = dma.done.wait (%p4893_p7), %s225_s12, 1024  }
  0x5a   : > { %3940 = vsyncadd (%p4893_p7), %s225_s12, 4294966272  ;;  %p4894_p13 = scmp.ne.s32.totalorder %s4882_s23, 0 }
  0x5c   : > { %3942 = dma.done.wait (%p4894_p13), [#allocation7], 2048  }
  0x5d   : > { %3944 = vsyncadd (%p4894_p13), [#allocation7], 4294965248  ;;  %v3983_v0 = vmov 0.0   ;;  %v275_v1 = vld [vmem:[#allocation6 + $0x8] sm:$0xff]  ;;  %v277_v2 = vld [vmem:[#allocation6 + $0x18] sm:$0xff]  ;;  %vm302_vm0 = vcmask 523264   ;;  %v292_v29 = vlaneseq }
  0x5e   : > { %391 = vmatprep.mubr.f32.mxu0 %v3983_v0  ;;  %v274_v3 = vld [vmem:[#allocation6] sm:$0xff]  ;;  %v3391_v4 = vpack.c.bf16 %v277_v2, %v275_v1  ;;  %v276_v5 = vld [vmem:[#allocation6 + $0x10] sm:$0xff]  ;;  %v279_v6 = vld [vmem:[#allocation6 + $0x28] sm:$0xff]  ;;  %vm576_vm1 = vcmask 130048   ;;  %s3984_s27 = smov 48   ;;  %s3985_s14 = smov 64  }
  0x5f   : > { %v281_v7 = vld [vmem:[#allocation6 + $0x38] sm:$0xff]  ;;  %v3393_v8 = vpack.c.bf16 %v276_v5, %v274_v3  ;;  %v278_v10 = vld [vmem:[#allocation6 + $0x20] sm:$0xff]  ;;  %v280_v11 = vld [vmem:[#allocation6 + $0x30] sm:$0xff]  ;;  %v293_v30 = vshrl.u32 %v292_v29, 7  ;;  %s3986_s21 = smov 112   ;;  %s3987_s22 = smov 32  }
  0x60   : > { %v3395_v9 = vpack.c.bf16 %v281_v7, %v279_v6  ;;  %v283_v12 = vld [vmem:[#allocation6 + $0x48] sm:$0xff]  ;;  %3392 = vmatprep.subr.bf16.mxu0 %v3391_v4  ;;  %v285_v13 = vld [vmem:[#allocation6 + $0x58] sm:$0xff]  ;;  %v3397_v14 = vpack.c.bf16 %v280_v11, %v278_v10  ;;  %v282_v16 = vld [vmem:[#allocation6 + $0x40] sm:$0xff]  ;;  %s3988_s28 = smov 96   ;;  %s3989_s13 = smov 16   ;;  %vm686_vm3 = vcmask 261120  }
  0x61   : > { %3394 = vmatpush1.bf16.msra.mxu0 %v3393_v8  ;;  %v3399_v15 = vpack.c.bf16 %v285_v13, %v283_v12  ;;  %v284_v17 = vld [vmem:[#allocation6 + $0x50] sm:$0xff]  ;;  %v287_v18 = vld [vmem:[#allocation6 + $0x68] sm:$0xff]  ;;  %v289_v19 = vld [vmem:[#allocation6 + $0x78] sm:$0xff]  ;;  %v294_v31 = vsub.s32 0, %v293_v30  ;;  %v298_v33 = vsub.s32 1, %v293_v30  ;;  %s3990_s24 = smov 80  }
  0x62   : > { %3396 = vmatprep.subr.bf16.mxu0 %v3395_v9  ;;  %v3401_v20 = vpack.c.bf16 %v284_v17, %v282_v16  ;;  %v3403_v21 = vpack.c.bf16 %v289_v19, %v287_v18  ;;  %v286_v22 = vld [vmem:[#allocation6 + $0x60] sm:$0xff]  ;;  %v288_v23 = vld [vmem:[#allocation6 + $0x70] sm:$0xff]  ;;  %v267_v26 = vld [vmem:[%s4178_s29 + $0x8] sm:$0xff]  ;;  %s2893_s30 = sshll.u32 %s4172_s7, 8  ;;  %s4449_s9 = scalar_lea.vmem [#allocation8], %s2890_s11  ;;  %vm1067_vm4 = vcmask 261248  }
  0x63   : > { %v3405_v24 = vpack.c.bf16 %v288_v23, %v286_v22  ;;  %v266_v25 = vld [vmem:[%s4178_s29] sm:$0xff]  ;;  %v268_v27 = vld [vmem:[%s4178_s29 + $0x10] sm:$0xff]  ;;  %v269_v28 = vld [vmem:[%s4178_s29 + $0x18] sm:$0xff]  ;;  %s4315_s6 = scalar_lea.vmem [#allocation9], %s2893_s30  ;;  %vm1347_vm5 = vcmask 392448   ;;  %vm1627_vm6 = vcmask 523648  }
  0x64   : > { %v290_v32 = vld [vmem:[%s4875_s2] sm:$0x3]  ;;  %vm4259_vm2 = vmpackc.low %vm576_vm1, %vm576_vm1  ;;  %s3038_s11 = sshll.u32 %s3967_s18, 12  ;;  %s2749_s12 = sshll.u32 %s4315_s6, 4  ;;  %s4773_s12 = int_to_ptr.vmem [resolvable:$true] %s2749_s12 }
  0x65   : > { %3398 = vmatpush1.bf16.msra.mxu0 %v3397_v14  ;;  %v4204_v34 = vrot.slane %v290_v32, %v294_v31  ;;  %v4206_v35 = vrot.slane %v290_v32, %v298_v33  ;;  %s4771_s25 = scalar_lea.hbm %s4877_s4, %s3038_s11 }
  0x66   : > { %3400 = vmatprep.subr.bf16.mxu0 %v3399_v15 }
  0x69   : > { %3402 = vmatpush1.bf16.msra.mxu0 %v3401_v20 }
  0x6a   : > { %3404 = vmatprep.subr.bf16.mxu0 %v3403_v21 }
  0x6d   : > { %3406 = vmatpush1.bf16.msra.mxu0 %v3405_v24 }
  0x70   : > { %2894 = vmatmul.mubr.msk.f32.vlgmr.msra.gmra.mrb[0].mxu0 %vm302_vm0, %v266_v25 }
  0x71   : > { %397 = vmatprep.mubr.f32.mxu0 %v3983_v0 }
  0x74   : > { %2895 = vmatmul.mubr.msk.f32.gmra.mrb[2].mxu0 %vm302_vm0, %v267_v26 }
  0x75   : > { %403 = vmatprep.mubr.f32.mxu0 %v3983_v0 }
  0x78   : > { %2896 = vmatmul.mubr.msk.f32.gmra.mrb[4].mxu0 %vm302_vm0, %v268_v27 }
  0x79   : > { %409 = vmatprep.mubr.f32.mxu0 %v3983_v0 }
  0x7c   : > { %2897 = vmatmul.mubr.msk.f32.gmra.mrb[6].mxu0 %vm302_vm0, %v269_v28 }
  0x7d   : > { %415 = vmatprep.mubr.f32.mxu0 %v3983_v0 }
 0x143   : > { %v393_v36 = vpop.f32.mrb[0].mxu0 }
 0x144   : > { %v394_v37 = vadd.f32 %v393_v36, %v4204_v34  ;;  %v395_v38 = vpop.f32.mrb[1].mxu0 }
 0x145   : > { %v396_v39 = vadd.f32 %v395_v38, %v4206_v35 }
 0x146   : > { %v4210_v40 = vmul.f32 0.25, %v394_v37 }
 0x147   : > { %441 = vst.msk [vmem:[#allocation2 + $0x8] sm:$0xff] %vm302_vm0, %v396_v39  ;;  %v399_v41 = vpop.f32.mrb[2].mxu0 }
 0x148   : > { %v400_v42 = vadd.f32 %v399_v41, %v4204_v34  ;;  %v401_v43 = vpop.f32.mrb[3].mxu0  ;;  %3175 = vmatprep.mubr.msk.f32.mxu1 %vm576_vm1, %v4210_v40 }
 0x149   : > { %v402_v44 = vadd.f32 %v401_v43, %v4206_v35 }
 0x14a   : > { %v3669_v45 = vpack.i.bf16 %v400_v42, %v394_v37  ;;  %v797_v59 = vmul.f32 0.25, %v400_v42 }
 0x14b   : > { %443 = vst.msk [vmem:[#allocation2 + $0x18] sm:$0xff] %vm302_vm0, %v402_v44  ;;  %v405_v46 = vpop.f32.mrb[4].mxu0 }
 0x14c   : > { %v406_v47 = vadd.f32 %v405_v46, %v4204_v34  ;;  %v407_v48 = vpop.f32.mrb[5].mxu0  ;;  %3670 = vrot.lane.b32.xlu1 %v3669_v45, %s3984_s27  ;;  %3660 = vrot.lane.b32.xlu0 %v3669_v45, %s3985_s14  ;;  %v271_v46 = vld [vmem:[%s4178_s29 + $0x28] sm:$0xff] }
 0x14d   : > { %v408_v49 = vadd.f32 %v407_v48, %v4206_v35  ;;  %v273_v48 = vld [vmem:[%s4178_s29 + $0x38] sm:$0xff] }
 0x14e   : > { %v489_v50 = vld [vmem:[#allocation2 + $0x8] sm:$0xff]  ;;  %v558_v1 = vmul.f32 0.25, %v406_v47 }
 0x14f   : > { %537 = vst.msk [vmem:[#allocation2 + $0x8] sm:$0xff] %vm302_vm0, %v489_v50  ;;  %445 = vst.msk [vmem:[#allocation2 + $0x28] sm:$0xff] %vm302_vm0, %v408_v49  ;;  %v411_v51 = vpop.f32.mrb[6].mxu0 }
 0x150   : > { %v412_v52 = vadd.f32 %v411_v51, %v4204_v34  ;;  %v413_v53 = vpop.f32.mrb[7].mxu0 }
 0x151   : > { %v414_v54 = vadd.f32 %v413_v53, %v4206_v35 }
 0x152   : > { %v491_v55 = vld [vmem:[#allocation2 + $0x18] sm:$0xff]  ;;  %v3674_v56 = vpack.i.bf16 %v412_v52, %v406_v47  ;;  %v559_v63 = vmul.f32 0.25, %v412_v52  ;;  %v272_v47 = vld [vmem:[%s4178_s29 + $0x30] sm:$0xff] }
 0x153   : > { %539 = vst.msk [vmem:[#allocation2 + $0x18] sm:$0xff] %vm302_vm0, %v491_v55  ;;  %447 = vst.msk [vmem:[#allocation2 + $0x38] sm:$0xff] %vm302_vm0, %v414_v54 }
 0x154   : > { %3675 = vrot.lane.b32.xlu1 %v3674_v56, %s3984_s27  ;;  %3665 = vrot.lane.b32.xlu0 %v3674_v56, %s3985_s14 }
 0x156   : > { %v493_v57 = vld [vmem:[#allocation2 + $0x28] sm:$0xff] }
 0x157   : > { %541 = vst.msk [vmem:[#allocation2 + $0x28] sm:$0xff] %vm302_vm0, %v493_v57  ;;  %v800_v60 = vld [vmem:[#allocation2 + $0x8] sm:$0xff] }
 0x158   : > { %808 = vrot.lane.b32.xlu1 %v4210_v40, %s3986_s21  ;;  %3680 = vrot.lane.b32.xlu0 %v3669_v45, %s3987_s22 }
 0x15a   : > { %v495_v58 = vld [vmem:[#allocation2 + $0x38] sm:$0xff] }
 0x15b   : > { %v801_v61 = vld [vmem:[#allocation2 + $0x18] sm:$0xff]  ;;  %543 = vst.msk [vmem:[#allocation2 + $0x38] sm:$0xff] %vm302_vm0, %v495_v58 }
 0x15c   : > { %v3419_v62 = vpack.c.bf16 %v801_v61, %v800_v60  ;;  %3685 = vrot.lane.b32.xlu1 %v3674_v56, %s3987_s22  ;;  %810 = vrot.lane.b32.xlu0 %v797_v59, %s3986_s21  ;;  %v3689_v6 = vpack.i.bf16 %v801_v61, %v800_v60 }
 0x15e   : > { %v802_v2 = vld [vmem:[#allocation2 + $0x28] sm:$0xff] }
 0x160   : > { %814 = vrot.lane.b32.xlu1 %v559_v63, %s3986_s21  ;;  %812 = vrot.lane.b32.xlu0 %v558_v1, %s3986_s21 }
 0x162   : > { %v803_v3 = vld [vmem:[#allocation2 + $0x38] sm:$0xff] }
 0x163   : > { %v3423_v4 = vpack.c.bf16 %v803_v3, %v802_v2  ;;  %v3694_v5 = vpack.i.bf16 %v803_v3, %v802_v2 }
 0x164   : > { %1090 = vrot.lane.b32.xlu1 %v797_v59, %s3988_s28  ;;  %1088 = vrot.lane.b32.xlu0 %v4210_v40, %s3988_s28 }
 0x168   : > { %1094 = vrot.lane.b32.xlu1 %v559_v63, %s3988_s28  ;;  %1092 = vrot.lane.b32.xlu0 %v558_v1, %s3988_s28 }
 0x16c   : > { %3695 = vrot.lane.b32.xlu1 %v3694_v5, %s3986_s21  ;;  %3690 = vrot.lane.b32.xlu0 %v3689_v6, %s3986_s21 }
 0x170   : > { %3705 = vrot.lane.b32.xlu1 %v3694_v5, %s3988_s28  ;;  %3700 = vrot.lane.b32.xlu0 %v3689_v6, %s3988_s28 }
 0x174   : > { %3715 = vrot.lane.b32.xlu1 %v3674_v56, %s3989_s13  ;;  %3710 = vrot.lane.b32.xlu0 %v3669_v45, %s3989_s13  ;;  %v270_v45 = vld [vmem:[%s4178_s29 + $0x20] sm:$0xff] }
 0x175   : > { %2898 = vmatmul.mubr.msk.f32.gmra.mrb[8].mxu0 %vm302_vm0, %v270_v45 }
 0x176   : > { %421 = vmatprep.mubr.f32.mxu0 %v3983_v0 }
 0x178   : > { %1370 = vrot.lane.b32.xlu1 %v797_v59, %s3990_s24  ;;  %1368 = vrot.lane.b32.xlu0 %v4210_v40, %s3990_s24 }
 0x179   : > { %2899 = vmatmul.mubr.msk.f32.gmra.mrb[10].mxu0 %vm302_vm0, %v271_v46 }
 0x17a   : > { %427 = vmatprep.mubr.f32.mxu0 %v3983_v0 }
 0x17c   : > { %1374 = vrot.lane.b32.xlu1 %v559_v63, %s3990_s24  ;;  %1372 = vrot.lane.b32.xlu0 %v558_v1, %s3990_s24 }
 0x17d   : > { %2900 = vmatmul.mubr.msk.f32.gmra.mrb[12].mxu0 %vm302_vm0, %v272_v47 }
 0x17e   : > { %433 = vmatprep.mubr.f32.mxu0 %v3983_v0 }
 0x180   : > { %3725 = vrot.lane.b32.xlu1 %v3694_v5, %s3990_s24  ;;  %3720 = vrot.lane.b32.xlu0 %v3689_v6, %s3990_s24 }
 0x181   : > { %2901 = vmatmul.mubr.msk.f32.gmra.mrb[14].mxu0 %vm302_vm0, %v273_v48 }
 0x184   : > { %3735 = vrot.lane.b32.xlu1 %v3983_v0, %s3985_s14 }
 0x188   : > { %3745 = vrot.lane.b32.xlu1 %v3983_v0, %s3984_s27 }
 0x1be   : > { %v3661_v7 = vpop.permute.xlu0 %3660  ;;  %v3671_v12 = vpop.permute.xlu1 %3670 }
 0x1bf   : > { %v3663_v8 = vunpack.i.h.bf16 %v3661_v7  ;;  %v3662_v9 = vunpack.i.l.bf16 %v3661_v7  ;;  %v3673_v24 = vunpack.i.h.bf16 %v3671_v12  ;;  %v3672_v25 = vunpack.i.l.bf16 %v3671_v12 }
 0x1c1   : > { %v3407_v11 = vpack.c.bf16 %v3663_v8, %v3662_v9  ;;  %v3427_v28 = vpack.c.bf16 %v3673_v24, %v3672_v25 }
 0x1c3   : > { %3409 = vmatprep.subr.msk.bf16.mxu1 %vm4259_vm2, %v3407_v11 }
 0x1c4   : > { %3412 = vmatpush3.bf16.xpose.msk.msra.mxu1 %vm4259_vm2, %v3407_v11 }
 0x1c6   : > { %v4267_v13 = vpop.permute.xlu1 %3675  ;;  %v3666_v14 = vpop.permute.xlu0 %3665 }
 0x1c7   : > { %v3668_v15 = vunpack.i.h.bf16 %v3666_v14  ;;  %v3667_v16 = vunpack.i.l.bf16 %v3666_v14  ;;  %v3678_v50 = vunpack.i.h.bf16 %v4267_v13  ;;  %v3677_v51 = vunpack.i.l.bf16 %v4267_v13 }
 0x1c9   : > { %v3413_v17 = vpack.c.bf16 %v3668_v15, %v3667_v16  ;;  %v3433_v57 = vpack.c.bf16 %v3678_v50, %v3677_v51 }
 0x1ca   : > { %v4269_v18 = vpop.permute.xlu1 %808  ;;  %v4271_v19 = vpop.permute.xlu0 %3680 }
 0x1cb   : > { %3415 = vmatprep.subr.msk.bf16.mxu1 %vm4259_vm2, %v3413_v17 }
 0x1cc   : > { %3418 = vmatpush3.bf16.xpose.msk.msra.mxu1 %vm4259_vm2, %v3413_v17 }
 0x1cd   : > { %3420 = vmatprep.subr.bf16.mxu1 %v3419_v62 }
 0x1ce   : > { %v4277_v20 = vpop.permute.xlu1 %3685  ;;  %v4279_v21 = vpop.permute.xlu0 %810 }
 0x1cf   : > { %v3688_v5 = vunpack.i.h.bf16 %v4277_v20  ;;  %v3687_v6 = vunpack.i.l.bf16 %v4277_v20 }
 0x1d1   : > { %v3453_v8 = vpack.c.bf16 %v3688_v5, %v3687_v6 }
 0x1d2   : > { %v4281_v22 = vpop.permute.xlu1 %814  ;;  %v4283_v23 = vpop.permute.xlu0 %812 }
 0x1d3   : > { %3176 = vmatmul.mubr.msk.f32.vlgmr.msra.gmra.mrb[0].mxu1 %vm576_vm1, %v797_v59 }
 0x1d4   : > { %3178 = vmatprep.mubr.msk.f32.mxu1 %vm576_vm1, %v558_v1  ;;  %3422 = vmatpush3.bf16.msra.mxu1 %v3419_v62  ;;  %v3683_v62 = vunpack.i.h.bf16 %v4271_v19 }
 0x1d5   : > { %3424 = vmatprep.subr.bf16.mxu1 %v3423_v4 }
 0x1d6   : > { %v4287_v26 = vpop.permute.xlu1 %1090  ;;  %v4289_v27 = vpop.permute.xlu0 %1088 }
 0x1d7   : > { %3179 = vmatmul.mubr.msk.f32.gmra.mrb[2].mxu1 %vm576_vm1, %v559_v63  ;;  %v3682_v63 = vunpack.i.l.bf16 %v4271_v19 }
 0x1d8   : > { %3426 = vmatpush3.bf16.msra.mxu1 %v3423_v4 }
 0x1d9   : > { %3429 = vmatprep.subr.msk.bf16.mxu1 %vm4259_vm2, %v3427_v28  ;;  %v3447_v3 = vpack.c.bf16 %v3683_v62, %v3682_v63 }
 0x1da   : > { %v4294_v29 = vpop.permute.xlu1 %1094  ;;  %v4296_v30 = vpop.permute.xlu0 %1092 }
 0x1de   : > { %v3696_v31 = vpop.permute.xlu1 %3695  ;;  %v3691_v32 = vpop.permute.xlu0 %3690 }
 0x1df   : > { %v3698_v33 = vunpack.i.h.bf16 %v3696_v31  ;;  %v3697_v36 = vunpack.i.l.bf16 %v3696_v31  ;;  %v3693_v37 = vunpack.i.h.bf16 %v3691_v32  ;;  %v3692_v38 = vunpack.i.l.bf16 %v3691_v32 }
 0x1e1   : > { %v3439_v39 = vpack.c.bf16 %v3693_v37, %v3692_v38  ;;  %v3443_v41 = vpack.c.bf16 %v3698_v33, %v3697_v36 }
 0x1e2   : > { %v3701_v40 = vpop.permute.xlu0 %3700  ;;  %v4325_v60 = vpop.permute.xlu1 %3705 }
 0x1e3   : > { %v3703_v42 = vunpack.i.h.bf16 %v3701_v40  ;;  %v3702_v43 = vunpack.i.l.bf16 %v3701_v40  ;;  %3440 = vmatprep.subr.bf16.mxu0 %v3439_v39  ;;  %v3708_v51 = vunpack.i.h.bf16 %v4325_v60 }
 0x1e4   : > { %3442 = vmatpush3.bf16.msra.mxu0 %v3439_v39 }
 0x1e5   : > { %3444 = vmatprep.subr.bf16.mxu0 %v3443_v41  ;;  %v4298_v44 = vpack.c.bf16 %v3703_v42, %v3702_v43 }
 0x1e6   : > { %v4319_v55 = vpop.permute.xlu0 %3710  ;;  %v4343_v2 = vpop.permute.xlu1 %3715 }
 0x1e7   : > { %v3718_v5 = vunpack.i.h.bf16 %v4343_v2 }
 0x1e8   : > { %3446 = vmatpush3.bf16.msra.mxu0 %v3443_v41 }
 0x1e9   : > { %3460 = vmatprep.subr.bf16.mxu0 %v4298_v44 }
 0x1ea   : > { %v4339_v1 = vpop.permute.xlu0 %1368  ;;  %v4353_v7 = vpop.permute.xlu1 %1370 }
 0x1ee   : > { %v4349_v4 = vpop.permute.xlu0 %1372  ;;  %v4363_v11 = vpop.permute.xlu1 %1374 }
 0x1f2   : > { %v3721_v9 = vpop.permute.xlu0 %3720  ;;  %v3726_v15 = vpop.permute.xlu1 %3725 }
 0x1f3   : > { %v3723_v12 = vunpack.i.h.bf16 %v3721_v9  ;;  %v3722_v13 = vunpack.i.l.bf16 %v3721_v9  ;;  %v3728_v16 = vunpack.i.h.bf16 %v3726_v15  ;;  %v3727_v17 = vunpack.i.l.bf16 %v3726_v15 }
 0x1f5   : > { %v3479_v14 = vpack.c.bf16 %v3723_v12, %v3722_v13 }
 0x248   : > { %v417_v19 = vpop.f32.mrb[8].mxu0 }
 0x249   : > { %v418_v20 = vadd.f32 %v417_v19, %v4204_v34 }
 0x24b   : > { %v4398_v37 = vmul.f32 0.25, %v418_v20 }
 0x2a6   : > { %v3177_v49 = vpop.f32.mrb[0].mxu1 }
 0x2a7   : > { %v683_v52 = vmax.f32 %v3177_v49, 0.0  ;;  %v663_v53 = vpop.f32.mrb[1].mxu1 }
 0x2a8   : > { %v682_v54 = vmax.f32 %v663_v53, 0.0 }
 0x2a9   : > { %785 = vst.msk [vmem:[%s4315_s6 + $0x8] sm:$0xff] %vm686_vm3, %v683_v52 }
 0x2aa   : > { %784 = vst.msk [vmem:[%s4315_s6] sm:$0xff] %vm686_vm3, %v682_v54  ;;  %v3180_v56 = vpop.f32.mrb[2].mxu1  ;;  %3189 = vmatprep.mubr.msk.f32.mxu1 %vm686_vm3, %v682_v54 }
 0x2ab   : > { %v685_v58 = vmax.f32 %v3180_v56, 0.0  ;;  %v673_v59 = vpop.f32.mrb[3].mxu1  ;;  %3190 = vmatmul.mubr.msk.f32.vlgmr.msra.gmra.mrb[4].mxu1 %vm686_vm3, %v683_v52  ;;  %v3707_v52 = vunpack.i.l.bf16 %v4325_v60 }
 0x2ac   : > { %v684_v61 = vmax.f32 %v673_v59, 0.0  ;;  %3432 = vmatpush3.bf16.xpose.msk.msra.mxu1 %vm4259_vm2, %v3427_v28  ;;  %v3713_v59 = vunpack.i.h.bf16 %v4319_v55 }
 0x2ad   : > { %787 = vst.msk [vmem:[%s4315_s6 + $0x18] sm:$0xff] %vm686_vm3, %v685_v58  ;;  %3435 = vmatprep.subr.msk.bf16.mxu1 %vm4259_vm2, %v3433_v57 }
 0x2ae   : > { %786 = vst.msk [vmem:[%s4315_s6 + $0x10] sm:$0xff] %vm686_vm3, %v684_v61  ;;  %3192 = vmatprep.mubr.msk.f32.mxu1 %vm686_vm3, %v684_v61  ;;  %v3712_v61 = vunpack.i.l.bf16 %v4319_v55 }
 0x2af   : > { %3193 = vmatmul.mubr.msk.f32.gmra.mrb[6].mxu1 %vm686_vm3, %v685_v58  ;;  %v3463_v58 = vpack.c.bf16 %v3708_v51, %v3707_v52 }
 0x2b0   : > { %3203 = vmatprep.mubr.msk.f32.mxu1 %vm576_vm1, %v4269_v18  ;;  %v3483_v18 = vpack.c.bf16 %v3728_v16, %v3727_v17 }
 0x2b4   : > { %3438 = vmatpush3.bf16.xpose.msk.msra.mxu1 %vm4259_vm2, %v3433_v57 }
 0x2b5   : > { %3449 = vmatprep.subr.msk.bf16.mxu1 %vm4259_vm2, %v3447_v3 }
 0x2bb   : > { %3204 = vmatmul.mubr.msk.f32.vlgmr.msra.gmra.mrb[8].mxu1 %vm576_vm1, %v4279_v21  ;;  %v419_v21 = vpop.f32.mrb[9].mxu0 }
 0x2bc   : > { %3206 = vmatprep.mubr.msk.f32.mxu1 %vm576_vm1, %v4283_v23  ;;  %3452 = vmatpush3.bf16.xpose.msk.msra.mxu1 %vm4259_vm2, %v3447_v3  ;;  %v423_v23 = vpop.f32.mrb[10].mxu0  ;;  %v3467_v3 = vpack.c.bf16 %v3713_v59, %v3712_v61 }
 0x2bd   : > { %3455 = vmatprep.subr.msk.bf16.mxu1 %vm4259_vm2, %v3453_v8  ;;  %v424_v24 = vadd.f32 %v423_v23, %v4204_v34  ;;  %v425_v25 = vpop.f32.mrb[11].mxu0 }
 0x2bf   : > { %3207 = vmatmul.mubr.msk.f32.gmra.mrb[10].mxu1 %vm576_vm1, %v4281_v22  ;;  %v420_v22 = vadd.f32 %v419_v21, %v4206_v35  ;;  %v4386_v32 = vmul.f32 0.25, %v424_v24 }
 0x2c0   : > { %3231 = vmatprep.mubr.msk.f32.mxu1 %vm576_vm1, %v4289_v27  ;;  %v429_v27 = vpop.f32.mrb[12].mxu0 }
 0x2c1   : > { %449 = vst.msk [vmem:[#allocation2 + $0x48] sm:$0xff] %vm302_vm0, %v420_v22  ;;  %v431_v28 = vpop.f32.mrb[13].mxu0  ;;  %1889 = vrot.lane.b32.xlu1 %v4386_v32, %s3986_s21 }
 0x2c2   : > { %v435_v31 = vpop.f32.mrb[14].mxu0 }
 0x2c3   : > { %v437_v34 = vpop.f32.mrb[15].mxu0 }
 0x2c4   : > { %3458 = vmatpush3.bf16.xpose.msk.msra.mxu1 %vm4259_vm2, %v3453_v8  ;;  %v438_v33 = vadd.f32 %v437_v34, %v4206_v35 }
 0x2c5   : > { %3480 = vmatprep.subr.bf16.mxu1 %v3479_v14  ;;  %1893 = vrot.lane.b32.xlu1 %v3983_v0, %s3986_s21 }
 0x2c6   : > { %455 = vst.msk [vmem:[#allocation2 + $0x78] sm:$0xff] %vm302_vm0, %v438_v33 }
 0x2c7   : > { %551 = vst.msk [vmem:[#allocation2 + $0x78] sm:$0xff] %vm302_vm0, %v3983_v0 }
 0x2c8   : > { %v497_v36 = vld [vmem:[#allocation2 + $0x48] sm:$0xff] }
 0x2c9   : > { %545 = vst.msk [vmem:[#allocation2 + $0x48] sm:$0xff] %vm302_vm0, %v497_v36 }
 0x2cb   : > { %3232 = vmatmul.mubr.msk.f32.vlgmr.msra.gmra.mrb[12].mxu1 %vm576_vm1, %v4287_v26  ;;  %v426_v26 = vadd.f32 %v425_v25, %v4206_v35 }
 0x2cc   : > { %3234 = vmatprep.mubr.msk.f32.mxu1 %vm576_vm1, %v4296_v30  ;;  %3482 = vmatpush3.bf16.msra.mxu1 %v3479_v14  ;;  %v432_v30 = vadd.f32 %v431_v28, %v4206_v35 }
 0x2cd   : > { %3484 = vmatprep.subr.bf16.mxu1 %v3483_v18  ;;  %451 = vst.msk [vmem:[#allocation2 + $0x58] sm:$0xff] %vm302_vm0, %v426_v26 }
 0x2ce   : > { %453 = vst.msk [vmem:[#allocation2 + $0x68] sm:$0xff] %vm302_vm0, %v432_v30  ;;  %v4411_v39 = vld [vmem:[#allocation2 + $0x78] sm:$0xff] }
 0x2cf   : > { %3235 = vmatmul.mubr.msk.f32.gmra.mrb[14].mxu1 %vm576_vm1, %v4294_v29  ;;  %v3729_v29 = vpack.i.bf16 %v424_v24, %v418_v20  ;;  %549 = vst.msk [vmem:[#allocation2 + $0x68] sm:$0xff] %vm302_vm0, %v3983_v0 }
 0x2d0   : > { %3486 = vmatpush3.bf16.msra.mxu1 %v3483_v18  ;;  %v1879_v40 = vld [vmem:[#allocation2 + $0x48] sm:$0xff] }
 0x2d1   : > { %3730 = vrot.lane.b32.xlu0 %v3729_v29, %s3985_s14  ;;  %s2714_s14 = scalar_lea.sflag [#allocation10], %s4172_s7 }
 0x2d4   : > { %v499_v38 = vld [vmem:[#allocation2 + $0x58] sm:$0xff] }
 0x2d5   : > { %3740 = vrot.lane.b32.xlu0 %v3729_v29, %s3984_s27  ;;  %547 = vst.msk [vmem:[#allocation2 + $0x58] sm:$0xff] %vm302_vm0, %v499_v38 }
 0x2d6   : > { %v4409_v35 = vld [vmem:[#allocation2 + $0x68] sm:$0xff] }
 0x2d7   : > { %v3754_v41 = vpack.i.bf16 %v4411_v39, %v4409_v35 }
 0x2d9   : > { %1887 = vrot.lane.b32.xlu0 %v4398_v37, %s3986_s21  ;;  %3755 = vrot.lane.b32.xlu1 %v3754_v41, %s3986_s21 }
 0x2dc   : > { %v1880_v42 = vld [vmem:[#allocation2 + $0x58] sm:$0xff] }
 0x2dd   : > { %1891 = vrot.lane.b32.xlu0 %v3983_v0, %s3986_s21  ;;  %v3749_v43 = vpack.i.bf16 %v1880_v42, %v1879_v40  ;;  %v4418_v45 = vpack.c.bf16 %v1880_v42, %v1879_v40  ;;  %3765 = vrot.lane.b32.xlu1 %v3983_v0, %s3987_s22 }
 0x2e1   : > { %3750 = vrot.lane.b32.xlu0 %v3749_v43, %s3986_s21  ;;  %2168 = vrot.lane.b32.xlu1 %v4386_v32, %s3988_s28  ;;  %s3857_s21 = scalar_lea.vmem %s4773_s12, 4096 }
 0x2e2   : > { %p3858_p4 = scmp.ne.s32.totalorder %s4773_s12, %s3857_s21 }
 0x2e4   : > { %p3859_p6 = pnand %p3858_p4, %p4116_p10 }
 0x2e5   : > { %3760 = vrot.lane.b32.xlu0 %v3729_v29, %s3987_s22  ;;  %2172 = vrot.lane.b32.xlu1 %v3983_v0, %s3988_s28 }
 0x2e6   : > { %p3860_p8 = pneg %p3859_p6 }
 0x2e9   : > { %2166 = vrot.lane.b32.xlu0 %v4398_v37, %s3988_s28  ;;  %3775 = vrot.lane.b32.xlu1 %v3754_v41, %s3988_s28 }
 0x2ed   : > { %2170 = vrot.lane.b32.xlu0 %v3983_v0, %s3988_s28  ;;  %3785 = vrot.lane.b32.xlu1 %v3983_v0, %s3989_s13 }
 0x2f1   : > { %3770 = vrot.lane.b32.xlu0 %v3749_v43, %s3988_s28  ;;  %2447 = vrot.lane.b32.xlu1 %v4386_v32, %s3990_s24 }
 0x2f5   : > { %3780 = vrot.lane.b32.xlu0 %v3729_v29, %s3989_s13  ;;  %2451 = vrot.lane.b32.xlu1 %v3983_v0, %s3990_s24  ;;  %v3736_v29 = vpop.permute.xlu1 %3735 }
 0x2f6   : > { %v3738_v34 = vunpack.i.h.bf16 %v3736_v29  ;;  %v3737_v33 = vunpack.i.l.bf16 %v3736_v29 }
 0x2f8   : > { %v3493_v42 = vpack.c.bf16 %v3738_v34, %v3737_v33 }
 0x2f9   : > { %2445 = vrot.lane.b32.xlu0 %v4398_v37, %s3990_s24  ;;  %3795 = vrot.lane.b32.xlu1 %v3754_v41, %s3990_s24  ;;  %v4527_v31 = vpop.permute.xlu1 %3745 }
 0x2fd   : > { %2449 = vrot.lane.b32.xlu0 %v3983_v0, %s3990_s24 }
 0x301   : > { %3790 = vrot.lane.b32.xlu0 %v3749_v43, %s3990_s24 }
 0x333   : > { %v4531_v40 = vpop.permute.xlu1 %1889 }
 0x337   : > { %v4545_v51 = vpop.permute.xlu1 %1893 }
 0x37e   : > { %v3191_v46 = vpop.f32.mrb[4].mxu1 }
 0x37f   : > { %789 = vst.msk [vmem:[%s4449_s9 + $0x8] sm:$0xff] %vm576_vm1, %v3191_v46  ;;  %v765_v47 = vpop.f32.mrb[5].mxu1 }
 0x380   : > { %788 = vst.msk [vmem:[%s4449_s9] sm:$0xff] %vm576_vm1, %v765_v47 }
 0x382   : > { %v3194_v48 = vpop.f32.mrb[6].mxu1 }
 0x383   : > { %791 = vst.msk [vmem:[%s4449_s9 + $0x18] sm:$0xff] %vm576_vm1, %v3194_v48  ;;  %v775_v49 = vpop.f32.mrb[7].mxu1 }
 0x384   : > { %790 = vst.msk [vmem:[%s4449_s9 + $0x10] sm:$0xff] %vm576_vm1, %v775_v49 }
 0x38e   : > { %v3205_v50 = vpop.f32.mrb[8].mxu1 }
 0x38f   : > { %v930_v53 = vmax.f32 %v3205_v50, 0.0  ;;  %v910_v54 = vpop.f32.mrb[9].mxu1 }
 0x390   : > { %v929_v56 = vmax.f32 %v910_v54, 0.0 }
 0x391   : > { %2927 = vst.msk [vmem:[%s4315_s6 + $0x48] sm:$0xff] %vm686_vm3, %v930_v53 }
 0x392   : > { %2926 = vst.msk [vmem:[%s4315_s6 + $0x40] sm:$0xff] %vm686_vm3, %v929_v56  ;;  %v3208_v57 = vpop.f32.mrb[10].mxu1  ;;  %3217 = vmatprep.mubr.msk.f32.mxu0 %vm686_vm3, %v929_v56 }
 0x393   : > { %v932_v62 = vmax.f32 %v3208_v57, 0.0  ;;  %v920_v63 = vpop.f32.mrb[11].mxu1  ;;  %3218 = vmatmul.mubr.msk.f32.vlgmr.msra.gmra.mrb[16].mxu0 %vm686_vm3, %v930_v53  ;;  %v3756_v53 = vpop.permute.xlu1 %3755 }
 0x394   : > { %v931_v60 = vmax.f32 %v920_v63, 0.0  ;;  %3462 = vmatpush3.bf16.msra.mxu0 %v4298_v44  ;;  %v3717_v44 = vunpack.i.l.bf16 %v4343_v2  ;;  %v3731_v2 = vpop.permute.xlu0 %3730  ;;  %v3758_v54 = vunpack.i.h.bf16 %v3756_v53  ;;  %v3757_v56 = vunpack.i.l.bf16 %v3756_v53 }
 0x395   : > { %2929 = vst.msk [vmem:[%s4315_s6 + $0x58] sm:$0xff] %vm686_vm3, %v932_v62  ;;  %3464 = vmatprep.subr.bf16.mxu0 %v3463_v58  ;;  %v3733_v17 = vunpack.i.h.bf16 %v3731_v2  ;;  %v3732_v18 = vunpack.i.l.bf16 %v3731_v2 }
 0x396   : > { %2928 = vst.msk [vmem:[%s4315_s6 + $0x50] sm:$0xff] %vm686_vm3, %v931_v60  ;;  %3220 = vmatprep.mubr.msk.f32.mxu0 %vm686_vm3, %v931_v60  ;;  %v3473_v13 = vpack.c.bf16 %v3718_v5, %v3717_v44  ;;  %v3523_v57 = vpack.c.bf16 %v3758_v54, %v3757_v56 }
 0x397   : > { %3221 = vmatmul.mubr.msk.f32.gmra.mrb[18].mxu0 %vm686_vm3, %v932_v62  ;;  %v3487_v19 = vpack.c.bf16 %v3733_v17, %v3732_v18  ;;  %v4566_v62 = vpop.permute.xlu1 %3765 }
 0x398   : > { %3466 = vmatpush3.bf16.msra.mxu0 %v3463_v58  ;;  %v3768_v53 = vunpack.i.h.bf16 %v4566_v62  ;;  %v3767_v54 = vunpack.i.l.bf16 %v4566_v62 }
 0x399   : > { %3469 = vmatprep.subr.msk.bf16.mxu0 %vm4259_vm2, %v3467_v3  ;;  %3489 = vmatprep.subr.msk.bf16.mxu1 %vm4259_vm2, %v3487_v19 }
 0x39b   : > { %v4568_v63 = vpop.permute.xlu1 %2168 }
 0x39e   : > { %v3233_v55 = vpop.f32.mrb[12].mxu1 }
 0x39f   : > { %v1210_v6 = vmax.f32 %v3233_v55, 0.0  ;;  %v1190_v8 = vpop.f32.mrb[13].mxu1  ;;  %v4572_v60 = vpop.permute.xlu1 %2172 }
 0x3a0   : > { %v1209_v9 = vmax.f32 %v1190_v8, 0.0 }
 0x3a1   : > { %2943 = vst.msk [vmem:[%s4315_s6 + $0x88] sm:$0xff] %vm686_vm3, %v1210_v6 }
 0x3a2   : > { %2942 = vst.msk [vmem:[%s4315_s6 + $0x80] sm:$0xff] %vm686_vm3, %v1209_v9  ;;  %v3236_v12 = vpop.f32.mrb[14].mxu1  ;;  %3245 = vmatprep.mubr.msk.f32.mxu0 %vm686_vm3, %v1209_v9 }
 0x3a3   : > { %v1212_v14 = vmax.f32 %v3236_v12, 0.0  ;;  %v1200_v15 = vpop.f32.mrb[15].mxu1  ;;  %3246 = vmatmul.mubr.msk.f32.vlgmr.msra.gmra.mrb[20].mxu0 %vm686_vm3, %v1210_v6  ;;  %v4576_v55 = vpop.permute.xlu1 %3775 }
 0x3a4   : > { %v1211_v16 = vmax.f32 %v1200_v15, 0.0  ;;  %3472 = vmatpush3.bf16.xpose.msk.msra.mxu0 %vm4259_vm2, %v3467_v3 }
 0x3a5   : > { %2945 = vst.msk [vmem:[%s4315_s6 + $0x98] sm:$0xff] %vm686_vm3, %v1212_v14  ;;  %3475 = vmatprep.subr.msk.bf16.mxu0 %vm4259_vm2, %v3473_v13 }
 0x3a6   : > { %2944 = vst.msk [vmem:[%s4315_s6 + $0x90] sm:$0xff] %vm686_vm3, %v1211_v16  ;;  %3248 = vmatprep.mubr.msk.f32.mxu0 %vm686_vm3, %v1211_v16 }
 0x3a7   : > { %3249 = vmatmul.mubr.msk.f32.gmra.mrb[22].mxu0 %vm686_vm3, %v1212_v14  ;;  %v4578_v5 = vpop.permute.xlu1 %3785 }
 0x3a8   : > { %3259 = vmatprep.mubr.msk.f32.mxu0 %vm576_vm1, %v4339_v1  ;;  %v3741_v1 = vpop.permute.xlu0 %3740 }
 0x3a9   : > { %v3743_v20 = vunpack.i.h.bf16 %v3741_v1  ;;  %v3742_v21 = vunpack.i.l.bf16 %v3741_v1 }
 0x3ab   : > { %v4510_v22 = vpack.c.bf16 %v3743_v20, %v3742_v21  ;;  %v4582_v6 = vpop.permute.xlu1 %2447 }
 0x3ac   : > { %3478 = vmatpush3.bf16.xpose.msk.msra.mxu0 %vm4259_vm2, %v3473_v13  ;;  %v4525_v30 = vpop.permute.xlu0 %1887 }
 0x3ad   : > { %3500 = vmatprep.subr.bf16.mxu0 %v4418_v45 }
 0x3af   : > { %v4586_v9 = vpop.permute.xlu1 %2451 }
 0x3b0   : > { %v4529_v36 = vpop.permute.xlu0 %1891 }
 0x3b3   : > { %3260 = vmatmul.mubr.msk.f32.vlgmr.msra.gmra.mrb[24].mxu0 %vm576_vm1, %v4353_v7  ;;  %v3503_v7 = vpack.c.bf16 %v4411_v39, %v4409_v35  ;;  %v4590_v13 = vpop.permute.xlu1 %3795 }
 0x3b4   : > { %3262 = vmatprep.mubr.msk.f32.mxu0 %vm576_vm1, %v4349_v4  ;;  %3502 = vmatpush3.bf16.msra.mxu0 %v4418_v45  ;;  %v3751_v47 = vpop.permute.xlu0 %3750 }
 0x3b5   : > { %3504 = vmatprep.subr.bf16.mxu0 %v3503_v7  ;;  %v3753_v49 = vunpack.i.h.bf16 %v3751_v47  ;;  %v3752_v50 = vunpack.i.l.bf16 %v3751_v47 }
 0x3b7   : > { %3263 = vmatmul.mubr.msk.f32.gmra.mrb[26].mxu0 %vm576_vm1, %v4363_v11  ;;  %v3519_v52 = vpack.c.bf16 %v3753_v49, %v3752_v50 }
 0x3b8   : > { %3506 = vmatpush3.bf16.msra.mxu0 %v3503_v7  ;;  %v3761_v58 = vpop.permute.xlu0 %3760 }
 0x3b9   : > { %3509 = vmatprep.subr.msk.bf16.mxu0 %vm4259_vm2, %v4510_v22  ;;  %v3763_v59 = vunpack.i.h.bf16 %v3761_v58  ;;  %v3762_v61 = vunpack.i.l.bf16 %v3761_v58 }
 0x466   : > { %v3219_v4 = vpop.f32.mrb[16].mxu0 }
 0x467   : > { %1057 = vrot.lane.b32.xlu1 %v3219_v4, %s3989_s13  ;;  %v1027_v23 = vpop.f32.mrb[17].mxu0 }
 0x468   : > { %1055 = vrot.lane.b32.xlu0 %v1027_v23, %s3989_s13 }
 0x46a   : > { %v3222_v11 = vpop.f32.mrb[18].mxu0 }
 0x46b   : > { %1061 = vrot.lane.b32.xlu1 %v3222_v11, %s3989_s13  ;;  %v1037_v24 = vpop.f32.mrb[19].mxu0  ;;  %v3748_v11 = vunpack.i.h.bf16 %v4527_v31 }
 0x46c   : > { %1059 = vrot.lane.b32.xlu0 %v1037_v24, %s3989_s13  ;;  %v3747_v24 = vunpack.i.l.bf16 %v4527_v31 }
 0x46e   : > { %v3513_v29 = vpack.c.bf16 %v3748_v11, %v3747_v24 }
 0x476   : > { %v3247_v25 = vpop.f32.mrb[20].mxu0 }
 0x477   : > { %1337 = vrot.lane.b32.xlu1 %v3247_v25, %s3987_s22  ;;  %v1307_v26 = vpop.f32.mrb[21].mxu0 }
 0x478   : > { %1335 = vrot.lane.b32.xlu0 %v1307_v26, %s3987_s22 }
 0x47a   : > { %v3250_v27 = vpop.f32.mrb[22].mxu0 }
 0x47b   : > { %1341 = vrot.lane.b32.xlu1 %v3250_v27, %s3987_s22  ;;  %v1317_v28 = vpop.f32.mrb[23].mxu0 }
 0x47c   : > { %1339 = vrot.lane.b32.xlu0 %v1317_v28, %s3987_s22 }
 0x486   : > { %v3261_v38 = vpop.f32.mrb[24].mxu0 }
 0x487   : > { %v1490_v35 = vmax.f32 %v3261_v38, 0.0  ;;  %v1470_v39 = vpop.f32.mrb[25].mxu0 }
 0x488   : > { %v1489_v41 = vmax.f32 %v1470_v39, 0.0 }
 0x489   : > { %2959 = vst.msk [vmem:[%s4315_s6 + $0xc8] sm:$0xff] %vm686_vm3, %v1490_v35 }
 0x48a   : > { %2958 = vst.msk [vmem:[%s4315_s6 + $0xc0] sm:$0xff] %vm686_vm3, %v1489_v41  ;;  %v3264_v43 = vpop.f32.mrb[26].mxu0  ;;  %3273 = vmatprep.mubr.msk.f32.mxu1 %vm686_vm3, %v1489_v41 }
 0x48b   : > { %v1492_v45 = vmax.f32 %v3264_v43, 0.0  ;;  %v1480_v46 = vpop.f32.mrb[27].mxu0  ;;  %3274 = vmatmul.mubr.msk.f32.vlgmr.msra.gmra.mrb[16].mxu1 %vm686_vm3, %v1490_v35 }
 0x48c   : > { %v1491_v48 = vmax.f32 %v1480_v46, 0.0  ;;  %3492 = vmatpush3.bf16.xpose.msk.msra.mxu1 %vm4259_vm2, %v3487_v19 }
 0x48d   : > { %2961 = vst.msk [vmem:[%s4315_s6 + $0xd8] sm:$0xff] %vm686_vm3, %v1492_v45  ;;  %3495 = vmatprep.subr.msk.bf16.mxu1 %vm4259_vm2, %v3493_v42 }
 0x48e   : > { %2960 = vst.msk [vmem:[%s4315_s6 + $0xd0] sm:$0xff] %vm686_vm3, %v1491_v48  ;;  %3276 = vmatprep.mubr.msk.f32.mxu1 %vm686_vm3, %v1491_v48 }
 0x48f   : > { %3277 = vmatmul.mubr.msk.f32.gmra.mrb[18].mxu1 %vm686_vm3, %v1492_v45 }
 0x490   : > { %3287 = vmatprep.mubr.msk.f32.mxu1 %vm576_vm1, %v4398_v37  ;;  %v4559_v37 = vpack.c.bf16 %v3763_v59, %v3762_v61  ;;  %v3533_v61 = vpack.c.bf16 %v3768_v53, %v3767_v54 }
 0x494   : > { %3498 = vmatpush3.bf16.xpose.msk.msra.mxu1 %vm4259_vm2, %v3493_v42  ;;  %v3777_v42 = vunpack.i.l.bf16 %v4576_v55 }
 0x495   : > { %3520 = vmatprep.subr.bf16.mxu1 %v3519_v52 }
 0x49b   : > { %3288 = vmatmul.mubr.msk.f32.vlgmr.msra.gmra.mrb[20].mxu1 %vm576_vm1, %v4386_v32  ;;  %v4570_v32 = vpop.permute.xlu0 %2166 }
 0x49c   : > { %3522 = vmatpush3.bf16.msra.mxu1 %v3519_v52  ;;  %3290 = vmatprep.mubr.msk.f32.mxu1 %vm576_vm1, %v3983_v0 }
 0x49d   : > { %3524 = vmatprep.subr.bf16.mxu1 %v3523_v57 }
 0x49f   : > { %3291 = vmatmul.mubr.msk.f32.gmra.mrb[22].mxu1 %vm576_vm1, %v3983_v0  ;;  %v4574_v3 = vpop.permute.xlu0 %2170 }
 0x4a0   : > { %3526 = vmatpush3.bf16.msra.mxu1 %v3523_v57 }
 0x4a1   : > { %3529 = vmatprep.subr.msk.bf16.mxu1 %vm4259_vm2, %v4559_v37 }
 0x4a3   : > { %v3771_v0 = vpop.permute.xlu0 %3770 }
 0x4a4   : > { %v3773_v31 = vunpack.i.h.bf16 %v3771_v0  ;;  %v3772_v39 = vunpack.i.l.bf16 %v3771_v0 }
 0x4a6   : > { %v3539_v41 = vpack.c.bf16 %v3773_v31, %v3772_v39 }
 0x4a7   : > { %v4580_v44 = vpop.permute.xlu0 %3780 }
 0x4a8   : > { %v3783_v45 = vunpack.i.h.bf16 %v4580_v44  ;;  %v3782_v46 = vunpack.i.l.bf16 %v4580_v44 }
 0x4ab   : > { %v4584_v8 = vpop.permute.xlu0 %2445 }
 0x4af   : > { %v4588_v12 = vpop.permute.xlu0 %2449 }
 0x4b3   : > { %v4592_v14 = vpop.permute.xlu0 %3790 }
 0x4b4   : > { %v3793_v62 = vunpack.i.h.bf16 %v4592_v14 }
 0x4d9   : > { %v1058_v15 = vpop.permute.xlu1 %1057 }
 0x4da   : > { %1069 = vst.msk [vmem:[%s4449_s9 + $0x8] sm:$0xff] %vm1067_vm4, %v1058_v15  ;;  %v1056_v16 = vpop.permute.xlu0 %1055 }
 0x4db   : > { %1068 = vst.msk [vmem:[%s4449_s9] sm:$0xff] %vm1067_vm4, %v1056_v16  ;;  %v3792_v16 = vunpack.i.l.bf16 %v4592_v14 }
 0x4dd   : > { %v1062_v2 = vpop.permute.xlu1 %1061 }
 0x4de   : > { %1071 = vst.msk [vmem:[%s4449_s9 + $0x18] sm:$0xff] %vm1067_vm4, %v1062_v2  ;;  %v1060_v17 = vpop.permute.xlu0 %1059  ;;  %v3559_v2 = vpack.c.bf16 %v3793_v62, %v3792_v16 }
 0x4df   : > { %1070 = vst.msk [vmem:[%s4449_s9 + $0x10] sm:$0xff] %vm1067_vm4, %v1060_v17  ;;  %v3797_v17 = vunpack.i.l.bf16 %v4590_v13 }
 0x4e9   : > { %v1338_v18 = vpop.permute.xlu1 %1337 }
 0x4ea   : > { %1349 = vst.msk [vmem:[%s4449_s9 + $0x8] sm:$0xff] %vm1347_vm5, %v1338_v18  ;;  %v1336_v19 = vpop.permute.xlu0 %1335 }
 0x4eb   : > { %1348 = vst.msk [vmem:[%s4449_s9] sm:$0xff] %vm1347_vm5, %v1336_v19 }
 0x4ed   : > { %v1342_v1 = vpop.permute.xlu1 %1341 }
 0x4ee   : > { %1351 = vst.msk [vmem:[%s4449_s9 + $0x18] sm:$0xff] %vm1347_vm5, %v1342_v1  ;;  %v1340_v20 = vpop.permute.xlu0 %1339 }
 0x4ef   : > { %1350 = vst.msk [vmem:[%s4449_s9 + $0x10] sm:$0xff] %vm1347_vm5, %v1340_v20 }
 0x55e   : > { %v3275_v21 = vpop.f32.mrb[16].mxu1 }
 0x55f   : > { %1617 = vrot.lane.b32.xlu1 %v3275_v21, %s3984_s27  ;;  %v1587_v7 = vpop.f32.mrb[17].mxu1 }
 0x560   : > { %1615 = vrot.lane.b32.xlu0 %v1587_v7, %s3984_s27 }
 0x562   : > { %v3278_v4 = vpop.f32.mrb[18].mxu1 }
 0x563   : > { %1621 = vrot.lane.b32.xlu1 %v3278_v4, %s3984_s27  ;;  %v1597_v23 = vpop.f32.mrb[19].mxu1 }
 0x564   : > { %1619 = vrot.lane.b32.xlu0 %v1597_v23, %s3984_s27 }
 0x56e   : > { %v3289_v25 = vpop.f32.mrb[20].mxu1 }
 0x56f   : > { %v1762_v26 = vmax.f32 %v3289_v25, 0.0  ;;  %v1742_v27 = vpop.f32.mrb[21].mxu1 }
 0x570   : > { %v1761_v28 = vmax.f32 %v1742_v27, 0.0 }
 0x571   : > { %2975 = vst.msk [vmem:[%s4315_s6 + $0x28] sm:$0xff] %vm686_vm3, %v1762_v26 }
 0x572   : > { %2974 = vst.msk [vmem:[%s4315_s6 + $0x20] sm:$0xff] %vm686_vm3, %v1761_v28  ;;  %v3292_v34 = vpop.f32.mrb[22].mxu1  ;;  %3301 = vmatprep.mubr.msk.f32.mxu0 %vm686_vm3, %v1761_v28 }
 0x573   : > { %v1764_v33 = vmax.f32 %v3292_v34, 0.0  ;;  %v1752_v38 = vpop.f32.mrb[23].mxu1  ;;  %3302 = vmatmul.mubr.msk.f32.vlgmr.msra.gmra.mrb[28].mxu0 %vm686_vm3, %v1762_v26 }
 0x574   : > { %v1763_v35 = vmax.f32 %v1752_v38, 0.0  ;;  %3512 = vmatpush3.bf16.xpose.msk.msra.mxu0 %vm4259_vm2, %v4510_v22  ;;  %v3778_v22 = vunpack.i.h.bf16 %v4576_v55 }
 0x575   : > { %2977 = vst.msk [vmem:[%s4315_s6 + $0x38] sm:$0xff] %vm686_vm3, %v1764_v33  ;;  %3515 = vmatprep.subr.msk.bf16.mxu0 %vm4259_vm2, %v3513_v29 }
 0x576   : > { %2976 = vst.msk [vmem:[%s4315_s6 + $0x30] sm:$0xff] %vm686_vm3, %v1763_v35  ;;  %3304 = vmatprep.mubr.msk.f32.mxu0 %vm686_vm3, %v1763_v35  ;;  %v3543_v43 = vpack.c.bf16 %v3778_v22, %v3777_v42 }
 0x577   : > { %3305 = vmatmul.mubr.msk.f32.gmra.mrb[30].mxu0 %vm686_vm3, %v1764_v33 }
 0x578   : > { %3315 = vmatprep.mubr.msk.f32.mxu0 %vm576_vm1, %v4525_v30  ;;  %v4645_v30 = vpack.c.bf16 %v3783_v45, %v3782_v46 }
 0x57c   : > { %3518 = vmatpush3.bf16.xpose.msk.msra.mxu0 %vm4259_vm2, %v3513_v29 }
 0x57d   : > { %3540 = vmatprep.subr.bf16.mxu0 %v3539_v41 }
 0x583   : > { %3316 = vmatmul.mubr.msk.f32.vlgmr.msra.gmra.mrb[32].mxu0 %vm576_vm1, %v4531_v40 }
 0x584   : > { %3542 = vmatpush3.bf16.msra.mxu0 %v3539_v41  ;;  %3318 = vmatprep.mubr.msk.f32.mxu0 %vm576_vm1, %v4529_v36 }
 0x585   : > { %3544 = vmatprep.subr.bf16.mxu0 %v3543_v43 }
 0x587   : > { %3319 = vmatmul.mubr.msk.f32.gmra.mrb[34].mxu0 %vm576_vm1, %v4545_v51 }
 0x588   : > { %3546 = vmatpush3.bf16.msra.mxu0 %v3543_v43 }
 0x589   : > { %3549 = vmatprep.subr.msk.bf16.mxu0 %vm4259_vm2, %v4645_v30 }
 0x5d1   : > { %v1618_v40 = vpop.permute.xlu1 %1617 }
 0x5d2   : > { %1629 = vst.msk [vmem:[%s4449_s9 + $0x8] sm:$0xff] %vm1627_vm6, %v1618_v40  ;;  %v1616_v36 = vpop.permute.xlu0 %1615 }
 0x5d3   : > { %1628 = vst.msk [vmem:[%s4449_s9] sm:$0xff] %vm1627_vm6, %v1616_v36 }
 0x5d5   : > { %v1622_v47 = vpop.permute.xlu1 %1621 }
 0x5d6   : > { %1631 = vst.msk [vmem:[%s4449_s9 + $0x18] sm:$0xff] %vm1627_vm6, %v1622_v47  ;;  %v1620_v48 = vpop.permute.xlu0 %1619 }
 0x5d7   : > { %1630 = vst.msk [vmem:[%s4449_s9 + $0x10] sm:$0xff] %vm1627_vm6, %v1620_v48 }
 0x646   : > { %v3303_v49 = vpop.f32.mrb[28].mxu0 }
 0x647   : > { %1868 = vst.msk [vmem:[%s4449_s9 + $0x28] sm:$0xff] %vm576_vm1, %v3303_v49  ;;  %v1843_v50 = vpop.f32.mrb[29].mxu0 }
 0x648   : > { %1867 = vst.msk [vmem:[%s4449_s9 + $0x20] sm:$0xff] %vm576_vm1, %v1843_v50 }
 0x64a   : > { %v3306_v51 = vpop.f32.mrb[30].mxu0 }
 0x64b   : > { %1870 = vst.msk [vmem:[%s4449_s9 + $0x38] sm:$0xff] %vm576_vm1, %v3306_v51  ;;  %v1853_v52 = vpop.f32.mrb[31].mxu0 }
 0x64c   : > { %1869 = vst.msk [vmem:[%s4449_s9 + $0x30] sm:$0xff] %vm576_vm1, %v1853_v52 }
 0x656   : > { %v3317_v56 = vpop.f32.mrb[32].mxu0 }
 0x657   : > { %v2009_v57 = vmax.f32 %v3317_v56, 0.0  ;;  %v1989_v58 = vpop.f32.mrb[33].mxu0 }
 0x658   : > { %v2008_v59 = vmax.f32 %v1989_v58, 0.0 }
 0x659   : > { %2991 = vst.msk [vmem:[%s4315_s6 + $0x68] sm:$0xff] %vm686_vm3, %v2009_v57 }
 0x65a   : > { %2990 = vst.msk [vmem:[%s4315_s6 + $0x60] sm:$0xff] %vm686_vm3, %v2008_v59  ;;  %v3320_v55 = vpop.f32.mrb[34].mxu0  ;;  %3329 = vmatprep.mubr.msk.f32.mxu1 %vm686_vm3, %v2008_v59 }
 0x65b   : > { %v2011_v0 = vmax.f32 %v3320_v55, 0.0  ;;  %v1999_v44 = vpop.f32.mrb[35].mxu0  ;;  %3330 = vmatmul.mubr.msk.f32.vlgmr.msra.gmra.mrb[24].mxu1 %vm686_vm3, %v2009_v57 }
 0x65c   : > { %v2010_v15 = vmax.f32 %v1999_v44, 0.0  ;;  %3532 = vmatpush3.bf16.xpose.msk.msra.mxu1 %vm4259_vm2, %v4559_v37  ;;  %v3798_v37 = vunpack.i.h.bf16 %v4590_v13 }
 0x65d   : > { %2993 = vst.msk [vmem:[%s4315_s6 + $0x78] sm:$0xff] %vm686_vm3, %v2011_v0  ;;  %3535 = vmatprep.subr.msk.bf16.mxu1 %vm4259_vm2, %v3533_v61 }
 0x65e   : > { %2992 = vst.msk [vmem:[%s4315_s6 + $0x70] sm:$0xff] %vm686_vm3, %v2010_v15  ;;  %3332 = vmatprep.mubr.msk.f32.mxu1 %vm686_vm3, %v2010_v15  ;;  %v3563_v18 = vpack.c.bf16 %v3798_v37, %v3797_v17 }
 0x65f   : > { %3333 = vmatmul.mubr.msk.f32.gmra.mrb[26].mxu1 %vm686_vm3, %v2011_v0 }
 0x660   : > { %3343 = vmatprep.mubr.msk.f32.mxu1 %vm576_vm1, %v4570_v32 }
 0x664   : > { %3538 = vmatpush3.bf16.xpose.msk.msra.mxu1 %vm4259_vm2, %v3533_v61 }
 0x665   : > { %3560 = vmatprep.subr.bf16.mxu1 %v3559_v2 }
 0x66b   : > { %3344 = vmatmul.mubr.msk.f32.vlgmr.msra.gmra.mrb[28].mxu1 %vm576_vm1, %v4568_v63  ;;  %v3788_v63 = vunpack.i.h.bf16 %v4578_v5 }
 0x66c   : > { %3562 = vmatpush3.bf16.msra.mxu1 %v3559_v2  ;;  %3346 = vmatprep.mubr.msk.f32.mxu1 %vm576_vm1, %v4574_v3 }
 0x66d   : > { %3564 = vmatprep.subr.bf16.mxu1 %v3563_v18 }
 0x66f   : > { %3347 = vmatmul.mubr.msk.f32.gmra.mrb[30].mxu1 %vm576_vm1, %v4572_v60  ;;  %v3787_v60 = vunpack.i.l.bf16 %v4578_v5 }
 0x670   : > { %3566 = vmatpush3.bf16.msra.mxu1 %v3563_v18 }
 0x671   : > { %v3553_v7 = vpack.c.bf16 %v3788_v63, %v3787_v60 }
 0x72e   : > { %v3331_v32 = vpop.f32.mrb[24].mxu1 }
 0x72f   : > { %2136 = vrot.lane.b32.xlu1 %v3331_v32, %s3989_s13  ;;  %v2106_v13 = vpop.f32.mrb[25].mxu1 }
 0x730   : > { %2134 = vrot.lane.b32.xlu0 %v2106_v13, %s3989_s13 }
 0x732   : > { %v3334_v14 = vpop.f32.mrb[26].mxu1 }
 0x733   : > { %v2116_v19 = vpop.f32.mrb[27].mxu1  ;;  %2140 = vrot.lane.b32.xlu1 %v3334_v14, %s3989_s13 }
 0x734   : > { %2138 = vrot.lane.b32.xlu0 %v2116_v19, %s3989_s13 }
 0x73e   : > { %v3345_v3 = vpop.f32.mrb[28].mxu1 }
 0x73f   : > { %v2288_v1 = vmax.f32 %v3345_v3, 0.0  ;;  %v2268_v20 = vpop.f32.mrb[29].mxu1 }
 0x740   : > { %v2287_v21 = vmax.f32 %v2268_v20, 0.0 }
 0x741   : > { %3007 = vst.msk [vmem:[%s4315_s6 + $0xa8] sm:$0xff] %vm686_vm3, %v2288_v1 }
 0x742   : > { %3006 = vst.msk [vmem:[%s4315_s6 + $0xa0] sm:$0xff] %vm686_vm3, %v2287_v21  ;;  %v3348_v4 = vpop.f32.mrb[30].mxu1  ;;  %3357 = vmatprep.mubr.msk.f32.mxu0 %vm686_vm3, %v2287_v21 }
 0x743   : > { %v2290_v23 = vmax.f32 %v3348_v4, 0.0  ;;  %v2278_v11 = vpop.f32.mrb[31].mxu1  ;;  %3358 = vmatmul.mubr.msk.f32.vlgmr.msra.gmra.mrb[36].mxu0 %vm686_vm3, %v2288_v1 }
 0x744   : > { %v2289_v5 = vmax.f32 %v2278_v11, 0.0  ;;  %3552 = vmatpush3.bf16.xpose.msk.msra.mxu0 %vm4259_vm2, %v4645_v30 }
 0x745   : > { %3009 = vst.msk [vmem:[%s4315_s6 + $0xb8] sm:$0xff] %vm686_vm3, %v2290_v23  ;;  %3555 = vmatprep.subr.msk.bf16.mxu0 %vm4259_vm2, %v3553_v7 }
 0x746   : > { %3008 = vst.msk [vmem:[%s4315_s6 + $0xb0] sm:$0xff] %vm686_vm3, %v2289_v5  ;;  %3360 = vmatprep.mubr.msk.f32.mxu0 %vm686_vm3, %v2289_v5 }
 0x747   : > { %3361 = vmatmul.mubr.msk.f32.gmra.mrb[38].mxu0 %vm686_vm3, %v2290_v23 }
 0x748   : > { %3371 = vmatprep.mubr.msk.f32.mxu0 %vm576_vm1, %v4584_v8 }
 0x74c   : > { %3558 = vmatpush3.bf16.xpose.msk.msra.mxu0 %vm4259_vm2, %v3553_v7 }
 0x753   : > { %3372 = vmatmul.mubr.msk.f32.vlgmr.msra.gmra.mrb[40].mxu0 %vm576_vm1, %v4582_v6 }
 0x754   : > { %3374 = vmatprep.mubr.msk.f32.mxu0 %vm576_vm1, %v4588_v12 }
 0x757   : > { %3375 = vmatmul.mubr.msk.f32.gmra.mrb[42].mxu0 %vm576_vm1, %v4586_v9 }
 0x7a1   : > { %v2137_v24 = vpop.permute.xlu1 %2136 }
 0x7a2   : > { %2147 = vst.msk [vmem:[%s4449_s9 + $0x28] sm:$0xff] %vm1067_vm4, %v2137_v24  ;;  %v2135_v25 = vpop.permute.xlu0 %2134 }
 0x7a3   : > { %2146 = vst.msk [vmem:[%s4449_s9 + $0x20] sm:$0xff] %vm1067_vm4, %v2135_v25 }
 0x7a5   : > { %v2141_v26 = vpop.permute.xlu1 %2140 }
 0x7a6   : > { %2149 = vst.msk [vmem:[%s4449_s9 + $0x38] sm:$0xff] %vm1067_vm4, %v2141_v26  ;;  %v2139_v10 = vpop.permute.xlu0 %2138 }
 0x7a7   : > { %2148 = vst.msk [vmem:[%s4449_s9 + $0x30] sm:$0xff] %vm1067_vm4, %v2139_v10 }
 0x816   : > { %v3359_v6 = vpop.f32.mrb[36].mxu0 }
 0x817   : > { %2415 = vrot.lane.b32.xlu1 %v3359_v6, %s3987_s22  ;;  %v2385_v8 = vpop.f32.mrb[37].mxu0 }
 0x818   : > { %2413 = vrot.lane.b32.xlu0 %v2385_v8, %s3987_s22 }
 0x81a   : > { %v3362_v9 = vpop.f32.mrb[38].mxu0 }
 0x81b   : > { %v2395_v12 = vpop.f32.mrb[39].mxu0  ;;  %2419 = vrot.lane.b32.xlu1 %v3362_v9, %s3987_s22 }
 0x81c   : > { %2417 = vrot.lane.b32.xlu0 %v2395_v12, %s3987_s22  ;;  %s3991_s22 = smov [#allocation9]  }
 0x81d   : > { %s3861_s28 = sshll.u32 %s3991_s22, 4  ;;  %s3862_s28 = int_to_ptr.vmem [resolvable:$false] %s3861_s28 }
 0x81e   : > { %s3863_s13 = scalar_lea.vmem %s3862_s28, 8192  ;;  %p3864_p12 = scmp.lt.s32.totalorder %s4773_s12, %s3862_s28 }
 0x81f   : > { %p3865_p11 = scmp.lt.s32.totalorder %s3863_s13, %s3857_s21 }
 0x821   : > { %p3866_p0 = por %p3865_p11, %p3864_p12 }
 0x823   : > { %p3867_p5 = pnand %p3866_p0, %p3860_p8 }
 0x826   : > { %v3373_v27 = vpop.f32.mrb[40].mxu0 }
 0x827   : > { %v2567_v28 = vmax.f32 %v3373_v27, 0.0  ;;  %v2547_v29 = vpop.f32.mrb[41].mxu0 }
 0x828   : > { %v2566_v34 = vmax.f32 %v2547_v29, 0.0 }
 0x829   : > { %3023 = vst.msk [vmem:[%s4315_s6 + $0xe8] sm:$0xff] %vm686_vm3, %v2567_v28 }
 0x82a   : > { %3022 = vst.msk [vmem:[%s4315_s6 + $0xe0] sm:$0xff] %vm686_vm3, %v2566_v34  ;;  %v3376_v33 = vpop.f32.mrb[42].mxu0  ;;  %3385 = vmatprep.mubr.msk.f32.mxu1 %vm686_vm3, %v2566_v34 }
 0x82b   : > { %v2569_v38 = vmax.f32 %v3376_v33, 0.0  ;;  %v2557_v35 = vpop.f32.mrb[43].mxu0  ;;  %3386 = vmatmul.mubr.msk.f32.vlgmr.msra.gmra.mrb[32].mxu1 %vm686_vm3, %v2567_v28 }
 0x82c   : > { %v2568_v31 = vmax.f32 %v2557_v35, 0.0 }
 0x82d   : > { %3025 = vst.msk [vmem:[%s4315_s6 + $0xf8] sm:$0xff] %vm686_vm3, %v2569_v38 }
 0x82e   : > { %3024 = vst.msk [vmem:[%s4315_s6 + $0xf0] sm:$0xff] %vm686_vm3, %v2568_v31  ;;  %3388 = vmatprep.mubr.msk.f32.mxu1 %vm686_vm3, %v2568_v31 }
 0x82f   : > { %3389 = vmatmul.mubr.msk.f32.gmra.mrb[34].mxu1 %vm686_vm3, %v2569_v38 }
 0x889   : > { %v2416_v39 = vpop.permute.xlu1 %2415 }
 0x88a   : > { %2426 = vst.msk [vmem:[%s4449_s9 + $0x28] sm:$0xff] %vm1347_vm5, %v2416_v39  ;;  %v2414_v41 = vpop.permute.xlu0 %2413 }
 0x88b   : > { %2425 = vst.msk [vmem:[%s4449_s9 + $0x20] sm:$0xff] %vm1347_vm5, %v2414_v41 }
 0x88d   : > { %v2420_v22 = vpop.permute.xlu1 %2419 }
 0x88e   : > { %2428 = vst.msk [vmem:[%s4449_s9 + $0x38] sm:$0xff] %vm1347_vm5, %v2420_v22  ;;  %v2418_v42 = vpop.permute.xlu0 %2417 }
 0x88f   : > { %2427 = vst.msk [vmem:[%s4449_s9 + $0x30] sm:$0xff] %vm1347_vm5, %v2418_v42 }
 0x890   : > { %3870 = shalt.err (!%p3867_p5)
}
 0x891   : > { %s3871_s24 = scalar_lea.hbm %s4771_s25, 4096  ;;  %s3875_s11 = scalar_lea.hbm %s4877_s4, 8192 }
 0x892   : > { %p3872_p9 = scmp.ne.s32.totalorder %s4771_s25, %s3871_s24  ;;  %p3876_p3 = scmp.lt.u32.totalorder %s4771_s25, %s4877_s4 }
 0x893   : > { %p3877_p7 = scmp.lt.u32.totalorder %s3875_s11, %s3871_s24  ;;  %p3879_p4 = scmp.lt.u32.totalorder %s3871_s24, %s4771_s25 }
 0x894   : > { %p3873_p1 = pnand %p3872_p9, %p4116_p10 }
 0x895   : > { %p3878_p13 = por %p3877_p7, %p3876_p3 }
 0x896   : > { %p3874_p2 = pneg %p3873_p1 }
 0x897   : > { %p3880_p6 = por %p3879_p4, %p3878_p13 }
 0x899   : > { %p3881_p8 = pnand %p3880_p6, %p3874_p2 }
 0x89b   : > { %3884 = shalt.err (!%p3881_p8)
}
 0x89c   : > { %s3992_s21 = smov 128   ;;  %s3993_s22 = smov 8  }
 0x89d   : > { %3574 = dma.vmem_to_hbm [thread:$0]  (%p4116_p10), %s4773_s12, 4096, %s4771_s25, %s2714_s14, %s3992_s21, %s3992_s21, %s3993_s22  }
 0x89e   : > { %s3036_s12 = sshll.u32 %s3967_s18, 10  ;;  %s2729_s25 = sshll.u32 %s4449_s9, 4  ;;  %s4817_s25 = int_to_ptr.vmem [resolvable:$true] %s2729_s25 }
 0x89f   : > { %s4815_s13 = scalar_lea.hbm %s4876_s3, %s3036_s12  ;;  %s2709_s18 = scalar_lea.sflag [#allocation5], %s4172_s7 }
 0x8a0   : > { %s3994_s24 = smov [#allocation8]  }
 0x8a1   : > { %s3889_s30 = sshll.u32 %s3994_s24, 4  ;;  %s3890_s30 = int_to_ptr.vmem [resolvable:$false] %s3889_s30 }
 0x8a2   : > { %s3891_s6 = scalar_lea.vmem %s3890_s30, 2048  ;;  %p3892_p5 = scmp.lt.s32.totalorder %s4817_s25, %s3890_s30 }
 0x8fe   : > { %v3387_v43 = vpop.f32.mrb[32].mxu1 }
 0x8ff   : > { %2694 = vrot.lane.b32.xlu1 %v3387_v43, %s3984_s27  ;;  %v2664_v45 = vpop.f32.mrb[33].mxu1 }
 0x900   : > { %2692 = vrot.lane.b32.xlu0 %v2664_v45, %s3984_s27 }
 0x902   : > { %v3390_v46 = vpop.f32.mrb[34].mxu1 }
 0x903   : > { %2698 = vrot.lane.b32.xlu1 %v3390_v46, %s3984_s27  ;;  %v2674_v30 = vpop.f32.mrb[35].mxu1 }
 0x904   : > { %2696 = vrot.lane.b32.xlu0 %v2674_v30, %s3984_s27  ;;  %s3885_s27 = scalar_lea.vmem %s4817_s25, 1024 }
 0x905   : > { %p3886_p12 = scmp.ne.s32.totalorder %s4817_s25, %s3885_s27  ;;  %p3893_p9 = scmp.lt.s32.totalorder %s3891_s6, %s3885_s27 }
 0x907   : > { %p3887_p11 = pnand %p3886_p12, %p4116_p10  ;;  %p3894_p1 = por %p3893_p9, %p3892_p5 }
 0x909   : > { %p3888_p0 = pneg %p3887_p11 }
 0x90b   : > { %p3895_p2 = pnand %p3894_p1, %p3888_p0 }
 0x971   : > { %v2695_v40 = vpop.permute.xlu1 %2694 }
 0x972   : > { %2705 = vst.msk [vmem:[%s4449_s9 + $0x28] sm:$0xff] %vm1627_vm6, %v2695_v40  ;;  %v2693_v36 = vpop.permute.xlu0 %2692 }
 0x973   : > { %2704 = vst.msk [vmem:[%s4449_s9 + $0x20] sm:$0xff] %vm1627_vm6, %v2693_v36 }
 0x975   : > { %v2699_v47 = vpop.permute.xlu1 %2698 }
 0x976   : > { %2707 = vst.msk [vmem:[%s4449_s9 + $0x38] sm:$0xff] %vm1627_vm6, %v2699_v47  ;;  %v2697_v48 = vpop.permute.xlu0 %2696 }
 0x977   : > { %2706 = vst.msk [vmem:[%s4449_s9 + $0x30] sm:$0xff] %vm1627_vm6, %v2697_v48 }
 0x978   : > { %3898 = shalt.err (!%p3895_p2)
}
 0x979   : > { %s3899_s9 = scalar_lea.hbm %s4815_s13, 1024  ;;  %s3903_s23 = scalar_lea.hbm %s4876_s3, 2048 }
 0x97a   : > { %p3900_p3 = scmp.ne.s32.totalorder %s4815_s13, %s3899_s9  ;;  %p3904_p4 = scmp.lt.u32.totalorder %s4815_s13, %s4876_s3 }
 0x97b   : > { %p3905_p6 = scmp.lt.u32.totalorder %s3903_s23, %s3899_s9  ;;  %p3907_p12 = scmp.lt.u32.totalorder %s3899_s9, %s4815_s13 }
 0x97c   : > { %p3901_p7 = pnand %p3900_p3, %p4116_p10 }
 0x97d   : > { %p3906_p8 = por %p3905_p6, %p3904_p4 }
 0x97e   : > { %p3902_p13 = pneg %p3901_p7 }
 0x97f   : > { %p3908_p11 = por %p3907_p12, %p3906_p8 }
 0x981   : > { %p3909_p0 = pnand %p3908_p11, %p3902_p13 }
 0x983   : > { %3912 = shalt.err (!%p3909_p0)
}
 0x984   : > { %3573 = dma.vmem_to_hbm [thread:$0]  (%p4116_p10), %s4817_s25, 1024, %s4815_s13, %s2709_s18, %s3992_s21, %s3992_s21, %s3993_s22  }
 0x985 PF: > { %s2764_s28 = sand.u32 1, %s3955_s15   ;;  %p4897_p5 = scmp.ne.s32.totalorder %s4885_s26, 0 }
 0x986   : > { %p4898_p9 = scmp.ge.s32.totalorder %s3975_s20, 2  ;;  %s2765_s27 = scalar_lea.sflag [#allocation5], %s2764_s28 }
 0x988   : > { %p3586_p1 = pnand %p4898_p9, %p4897_p5 }
 0x98a   : > { %3946 = dma.done.wait (!%p3586_p1), %s2765_s27, 1024  }
 0x98b   : > { %3948 = vsyncadd (!%p3586_p1), %s2765_s27, 4294966272  ;;  %s2774_s8 = scalar_lea.sflag [#allocation10], %s2764_s28 }
 0x98c   : > { %3950 = dma.done.wait (!%p3586_p1), %s2774_s8, 4096  }
 0x98d   : > { %3952 = vsyncadd (!%p3586_p1), %s2774_s8, 4294963200  ;;  %s25_s20 = sadd.s32 1, %s3975_s20   ;;  %s4899_s15 = smov %s3959_s16 }
 0x98e   : > { %p22_p2 = scmp.ge.s32.totalorder %s25_s20, 4   ;;  %s4900_s16 = smov %s3963_s17 }
 0x98f   : > { %s4901_s17 = smov %s4125_s10  ;;  %s4902_s18 = smov %s3971_s19 }
 0x990   : > { %s4903_s19 = smov %s4905_s5  ;;  %24 = sbr.rel (!%p22_p2) target bundleno = 9 (0x9), region = 109 }
 0x997   :  { %2779 = vsyncpa [#allocation4], 1 }
 0x998   :  { %2781 = vsyncpa [#allocation4 + $0x1], 1 }
 0x999   :  { %2782 = vsyncpa [#allocation7], 1 }
 0x99a   :  { %2783 = vsyncpa [#allocation5], 1 }
 0x99b   :  { %2785 = vsyncpa [#allocation5 + $0x1], 1 }
 0x99c   :  { %2786 = vsyncpa [#allocation10], 1 }
 0x99d   :  { %2788 = vsyncpa [#allocation10 + $0x1], 1 }

</bundles_post_ra>
